<compile_context>
chip_gen: v6e
topology: v6e:2x2x1
jax: 0.10.0
libtpu: 0.0.40
codegen_flags: <defaults>
</compile_context>

<pallas_src>
import jax
import jax.numpy as jnp
from jax.experimental import pallas as pl
from jax.experimental.pallas import tpu as pltpu


_GATE_ORDER = (0, 1, 3, 2)  # (i, f, o, g): sigmoid gates contiguous, tanh gate last


def _round_up(n, m):
    return -(-n // m) * m


# ----------------------------------------------------------------------------
# Parameter construction (per-gate torch-like format, used by the reference).
# ----------------------------------------------------------------------------
def init_lstm_params(key, input_size, hidden_size, num_layers):
    params = []
    bound = 1.0 / (hidden_size ** 0.5)
    for layer in range(num_layers):
        in_sz = input_size if layer == 0 else hidden_size
        key, k1, k2, k3, k4 = jax.random.split(key, 5)
        w_ih = jax.random.uniform(k1, (4, in_sz, hidden_size), jnp.float32,
                                  -bound, bound)
        w_hh = jax.random.uniform(k2, (4, hidden_size, hidden_size), jnp.float32,
                                  -bound, bound)
        b_ih = jax.random.uniform(k3, (4, 1, hidden_size), jnp.float32,
                                  -bound, bound)
        b_hh = jax.random.uniform(k4, (4, 1, hidden_size), jnp.float32,
                                  -bound, bound)
        params.append((w_ih, w_hh, b_ih + b_hh))       # gate order (i, f, g, o)
    return params, key


def init_head_params(key, d_feat, s_feat, hidden):
    # BatchNorm1d default init: gamma=1, beta=0, running_mean=0, running_var=1.
    eps = 1e-5
    in_features = d_feat + s_feat + 1
    h2 = hidden // 2

    def bn_fold(n):
        gamma = jnp.ones((1, n), jnp.float32)
        beta = jnp.zeros((1, n), jnp.float32)
        r_mean = jnp.zeros((1, n), jnp.float32)
        r_var = jnp.ones((1, n), jnp.float32)
        scale = gamma / jnp.sqrt(r_var + eps)
        shift = beta - r_mean * scale
        return scale, shift

    s1, t1 = bn_fold(in_features)
    s2, t2 = bn_fold(h2)
    key, k1, k2, k3, k4 = jax.random.split(key, 5)
    bnd1 = 1.0 / (in_features ** 0.5)
    w1 = jax.random.uniform(k1, (in_features, h2), jnp.float32, -bnd1, bnd1)
    b1 = jax.random.uniform(k2, (1, h2), jnp.float32, -bnd1, bnd1)
    bnd2 = 1.0 / (h2 ** 0.5)
    w2 = jax.random.uniform(k3, (1, h2), jnp.float32, -bnd2, bnd2)
    b2 = jax.random.uniform(k4, (1, 1), jnp.float32, -bnd2, bnd2)
    head = dict(s1=s1, t1=t1, w1=w1, b1=b1, s2=s2, t2=t2, w2=w2, b2=b2)
    return head, key


# ----------------------------------------------------------------------------
# Packing: per-gate params -> a handful of flat, gate-fused kernel buffers.
# ----------------------------------------------------------------------------
def pack_lstm_stack(layers):
    """layers: list of (w_ih (4,Din,H), w_hh (4,H,H), bias (4,1,H)), gates (i,f,g,o).

    Returns:
      W    : bf16 (rows, 4H) -- per-layer [w_ih ; w_hh] blocks, row offsets
             16-aligned, lane gate order (i, f, o, g).
      Bias : f32  (n_layers, 4H) -- b_ih + b_hh, same gate order.
      layout: tuple per layer of static ints (wih_row, din, whh_row, H).
    """
    blocks, biases, layout = [], [], []
    row = 0
    for (w_ih, w_hh, b) in layers:
        din, H = w_ih.shape[1], w_ih.shape[2]
        din_pad = _round_up(din, 16)
        h_pad = _round_up(H, 16)
        wih = jnp.concatenate([w_ih[g] for g in _GATE_ORDER], axis=1)   # (din, 4H)
        whh = jnp.concatenate([w_hh[g] for g in _GATE_ORDER], axis=1)   # (H,   4H)
        bias = jnp.concatenate([b[g] for g in _GATE_ORDER], axis=1)     # (1,   4H)
        wih_blk = jnp.zeros((din_pad, 4 * H), jnp.float32).at[:din].set(wih)
        whh_blk = jnp.zeros((h_pad, 4 * H), jnp.float32).at[:H].set(whh)
        layout.append((row, din, row + din_pad, H))
        blocks += [wih_blk, whh_blk]
        biases.append(bias)
        row += din_pad + h_pad
    W = jnp.concatenate(blocks, axis=0).astype(jnp.bfloat16)
    Bias = jnp.concatenate(biases, axis=0)
    return W, Bias, tuple(layout)


def pack_head(head, d_feat, s_feat):
    """Head params -> two f32 buffers (BN1 scale/shift groups; Linear/BN2 rows)."""
    s1, t1, w1, b1 = head["s1"], head["t1"], head["w1"], head["b1"]
    s2, t2, w2, b2 = head["s2"], head["t2"], head["w2"], head["b2"]
    h2 = w1.shape[1]

    bn1 = jnp.zeros((8, d_feat), jnp.float32)
    bn1 = bn1.at[0, :d_feat].set(s1[0, :d_feat])
    bn1 = bn1.at[1, :d_feat].set(t1[0, :d_feat])
    bn1 = bn1.at[2, :s_feat].set(s1[0, d_feat:d_feat + s_feat])
    bn1 = bn1.at[3, :s_feat].set(t1[0, d_feat:d_feat + s_feat])
    bn1 = bn1.at[4, 0].set(s1[0, d_feat + s_feat])
    bn1 = bn1.at[5, 0].set(t1[0, d_feat + s_feat])

    r = d_feat + s_feat
    rows = _round_up(r + 6, 8)
    lin = jnp.zeros((rows, h2), jnp.float32)
    lin = lin.at[:r + 1].set(w1)            # w1d rows | w1s rows | w1m row
    lin = lin.at[r + 1].set(b1[0])
    lin = lin.at[r + 2].set(s2[0])
    lin = lin.at[r + 3].set(t2[0])
    lin = lin.at[r + 4].set(w2[0])
    lin = lin.at[r + 5, 0].set(b2[0, 0])
    return bn1, lin


# ----------------------------------------------------------------------------
# The single fused kernel (no grid, everything VMEM resident).
# ----------------------------------------------------------------------------
def _make_kernel(B, Td, Ts, layout_d, layout_s):
    h_d = layout_d[0][3]
    h_s = layout_s[0][3]

    def lstm_stack(x, w_ref, b_ref, layout, T, seq_ref):
        """x: (T*B, Din0) f32 time-major. Returns final-step hidden (B, H)."""
        n_layers = len(layout)
        h = None
        for li, (wih_r0, din, whh_r0, H) in enumerate(layout):
            wih = w_ref[wih_r0:wih_r0 + din, :]            # bf16 (Din, 4H)
            whh = w_ref[whh_r0:whh_r0 + H, :]              # bf16 (H,   4H)
            bias = b_ref[li:li + 1, :]                     # f32  (1,   4H)
            # Hoisted input projection: ONE matmul over all timesteps, bias once.
            gx = jnp.dot(x.astype(jnp.bfloat16), wih,
                         preferred_element_type=jnp.float32) + bias   # (T*B, 4H)
            h = jnp.zeros((B, H), jnp.float32)
            c = jnp.zeros((B, H), jnp.float32)
            last = li == n_layers - 1
            for t in range(T):                             # fully unrolled
                # ONE gate-fused recurrent matmul per step (bf16 in, f32 acc).
                z = gx[t * B:(t + 1) * B, :] + jnp.dot(
                    h.astype(jnp.bfloat16), whh,
                    preferred_element_type=jnp.float32)    # (B, 4H), lanes i|f|o|g
                sg = jax.nn.sigmoid(z[:, :3 * H])          # i,f,o in one EUP pass
                g = jnp.tanh(z[:, 3 * H:])                 # g in one EUP pass
                c = sg[:, H:2 * H] * c + sg[:, :H] * g
                h = sg[:, 2 * H:3 * H] * jnp.tanh(c)
                if not last:
                    seq_ref[t * B:(t + 1) * B, :H] = h     # next layer's input
            if not last:
                x = seq_ref[:T * B, :H]
        return h

    def kernel(xd_ref, xs_ref, xm_ref, wd_ref, bd_ref, ws_ref, bs_ref,
               bn1_ref, lin_ref, out_ref, seq_ref):
        # Two independent LSTM stacks; all intermediates stay in VMEM/vregs.
        hd = lstm_stack(xd_ref[...], wd_ref, bd_ref, layout_d, Td, seq_ref)  # (B, 64)
        hs = lstm_stack(xs_ref[...], ws_ref, bs_ref, layout_s, Ts, seq_ref)  # (B, Hs)
        xm = xm_ref[...]                                                      # (B, 1)

        # Head: BN(eval)->ReLU->Linear->BN(eval)->ReLU->(Dropout=id)->Linear.
        # Linear1 split over (hd | hs | xm) groups == Linear(concat(...)).
        hd_n = jnp.maximum(hd * bn1_ref[0:1, :h_d] + bn1_ref[1:2, :h_d], 0.0)
        hs_n = jnp.maximum(hs * bn1_ref[2:3, :h_s] + bn1_ref[3:4, :h_s], 0.0)
        hm_n = jnp.maximum(xm * bn1_ref[4:5, 0:1] + bn1_ref[5:6, 0:1], 0.0)

        r = h_d + h_s
        hh = (jnp.dot(hd_n, lin_ref[0:h_d, :], preferred_element_type=jnp.float32)
              + jnp.dot(hs_n, lin_ref[h_d:r, :], preferred_element_type=jnp.float32)
              + hm_n * lin_ref[r:r + 1, :]          # rank-1 term, no MXU needed
              + lin_ref[r + 1:r + 2, :])
        hh = jnp.maximum(hh * lin_ref[r + 2:r + 3, :] + lin_ref[r + 3:r + 4, :], 0.0)
        # Final (H2 -> 1) linear as VPU multiply + lane reduce (no N=1 matmul).
        out_ref[...] = (jnp.sum(hh * lin_ref[r + 4:r + 5, :], axis=-1, keepdims=True)
                        + lin_ref[r + 5:r + 6, 0:1])

    return kernel


def make_forward(layout_d, layout_s):
    """Returns forward(packed, xd, xs, xa, xm) -> (B,)."""
    def forward(packed, xd, xs, xa, xm):
        del xa  # unused by the reference forward pass
        wd, bd, ws, bs, bn1, lin = packed
        B, Td, M = xd.shape
        _, Ts, _ = xs.shape

        # Time-major (T*B, Din) inputs: tiny XLA transpose outside the kernel.
        xd_tm = jnp.transpose(xd, (1, 0, 2)).reshape(Td * B, M).astype(jnp.float32)
        xs_tm = jnp.transpose(xs, (1, 0, 2)).reshape(Ts * B, M).astype(jnp.float32)
        xm2 = xm.reshape(B, 1).astype(jnp.float32)

        # Inter-layer sequence scratch (only used by stacks with >1 layer).
        multi_h = [lay[0][3] for lay in (layout_d, layout_s) if len(lay) > 1]
        seq_lanes = max(multi_h) if multi_h else 8
        seq_rows = _round_up(max(Td, Ts) * B, 8)

        kernel = _make_kernel(B, Td, Ts, layout_d, layout_s)
        inputs = (xd_tm, xs_tm, xm2, wd, bd, ws, bs, bn1, lin)
        vmem_spec = pl.BlockSpec(memory_space=pltpu.MemorySpace.VMEM)
        out = pl.pallas_call(
            kernel,
            out_shape=jax.ShapeDtypeStruct((B, 1), jnp.float32),
            in_specs=[vmem_spec] * len(inputs),
            out_specs=vmem_spec,
            scratch_shapes=[pltpu.VMEM((seq_rows, seq_lanes), jnp.float32)],
        )(*inputs)
        return out.reshape(-1)
    return forward


# ----------------------------------------------------------------------------
# Pure-JAX f32 reference (mirrors the PyTorch forward exactly).
# ----------------------------------------------------------------------------
def _lstm_ref(x_bf, layers):
    x = x_bf.astype(jnp.float32)                  # (B, T, Din)
    for (wih, whh, b) in layers:
        B = x.shape[0]
        H = whh.shape[1]

        def step(carry, x_t, wih=wih, whh=whh, b=b):
            h, c = carry
            zi = x_t @ wih[0] + h @ whh[0] + b[0]
            zf = x_t @ wih[1] + h @ whh[1] + b[1]
            zg = x_t @ wih[2] + h @ whh[2] + b[2]
            zo = x_t @ wih[3] + h @ whh[3] + b[3]
            i = jax.nn.sigmoid(zi)
            f = jax.nn.sigmoid(zf)
            g = jnp.tanh(zg)
            o = jax.nn.sigmoid(zo)
            c = f * c + i * g
            h = o * jnp.tanh(c)
            return (h, c), h

        init = (jnp.zeros((B, H), jnp.float32), jnp.zeros((B, H), jnp.float32))
        _, hs = jax.lax.scan(step, init, jnp.transpose(x, (1, 0, 2)))
        x = jnp.transpose(hs, (1, 0, 2))
    return x[:, -1, :]


def _forward_ref(params, xd, xs, xa, xm):
    del xa
    d_layers, s_layers, head = params
    xd_out = _lstm_ref(xd, d_layers)
    xs_out = _lstm_ref(xs, s_layers)
    tmp = jnp.concatenate(
        [xd_out, xs_out, xm.reshape(-1, 1).astype(jnp.float32)], axis=1)
    h = jnp.maximum(tmp * head["s1"] + head["t1"], 0.0)   # BN1 (eval) -> ReLU
    h = h @ head["w1"] + head["b1"]                       # Linear
    h = jnp.maximum(h * head["s2"] + head["t2"], 0.0)     # BN2 (eval) -> ReLU; Dropout=id
    out = h @ head["w2"].T + head["b2"]                   # Linear -> (B, 1)
    return out.reshape(-1)


if __name__ == "__main__":
    model_cfg = dict(dflt_seq=8, hist_seq=8, mean_val=4, features=32, layers=2)
    B = 2
    DFLT, HIST = model_cfg["dflt_seq"], model_cfg["hist_seq"]
    M = model_cfg["mean_val"]
    HID = model_cfg["features"]
    NL = model_cfg["layers"]

    key = jax.random.PRNGKey(0)
    lstm_d_params, key = init_lstm_params(key, M, 64, 1)
    lstm_s_params, key = init_lstm_params(key, M, HID, NL)
    head_params, key = init_head_params(key, 64, HID, HID)
    params = (lstm_d_params, lstm_s_params, head_params)

    # One-time packing into gate-fused bf16 weight / f32 bias / head buffers.
    wd, bd, layout_d = pack_lstm_stack(lstm_d_params)
    ws, bs, layout_s = pack_lstm_stack(lstm_s_params)
    bn1, lin = pack_head(head_params, 64, HID)
    packed = (wd, bd, ws, bs, bn1, lin)

    key, kd, ks, ka, km = jax.random.split(key, 5)
    xd = jax.random.normal(kd, (B, DFLT, M), jnp.float32)
    xs = jax.random.normal(ks, (B, HIST, M), jnp.float32)
    xa = jax.random.normal(ka, (B, HIST, M), jnp.float32)   # unused by forward
    xm = jax.random.normal(km, (B,), jnp.float32)

    fwd = jax.jit(make_forward(layout_d, layout_s))
    out = jax.block_until_ready(fwd(packed, xd, xs, xa, xm))

    ref = _forward_ref(params, xd, xs, xa, xm)
    assert out.shape == (B,)
    # bf16 MXU operands (f32 accumulation/state) -> slightly looser tolerance.
    assert jnp.allclose(out, ref, atol=5e-2, rtol=5e-2), (out, ref)

    print("KERNEL_OK")
</pallas_src>

<mosaic_0001>
module attributes {stable_mosaic.version = 11 : i64} {
  func.func @kernel(%arg0: memref<16x4xf32, #tpu.memory_space<vmem>>, %arg1: memref<16x4xf32, #tpu.memory_space<vmem>>, %arg2: memref<2x1xf32, #tpu.memory_space<vmem>>, %arg3: memref<80x256xbf16, #tpu.memory_space<vmem>>, %arg4: memref<1x256xf32, #tpu.memory_space<vmem>>, %arg5: memref<112x128xbf16, #tpu.memory_space<vmem>>, %arg6: memref<2x128xf32, #tpu.memory_space<vmem>>, %arg7: memref<8x64xf32, #tpu.memory_space<vmem>>, %arg8: memref<104x16xf32, #tpu.memory_space<vmem>>, %arg9: memref<2x1xf32, #tpu.memory_space<vmem>>, %arg10: memref<16x32xf32, #tpu.memory_space<vmem>>) attributes {dimension_semantics = [], scalar_prefetch = 0 : i64, scratch_operands = 1 : i64, tpu.core_type = #tpu.core_type<tc>} {
    %c0 = arith.constant 0 : index
    %c0_0 = arith.constant 0 : index
    %0 = vector.load %arg0[%c0, %c0_0] : memref<16x4xf32, #tpu.memory_space<vmem>>, vector<16x4xf32>
    %c0_1 = arith.constant 0 : index
    %c0_2 = arith.constant 0 : index
    %1 = vector.load %arg3[%c0_1, %c0_2] : memref<80x256xbf16, #tpu.memory_space<vmem>>, vector<4x256xbf16>
    %c16 = arith.constant 16 : index
    %c0_3 = arith.constant 0 : index
    %2 = vector.load %arg3[%c16, %c0_3] : memref<80x256xbf16, #tpu.memory_space<vmem>>, vector<64x256xbf16>
    %c0_4 = arith.constant 0 : index
    %c0_5 = arith.constant 0 : index
    %3 = vector.load %arg4[%c0_4, %c0_5] : memref<1x256xf32, #tpu.memory_space<vmem>>, vector<1x256xf32>
    %4 = arith.truncf %0 : vector<16x4xf32> to vector<16x4xbf16>
    %cst = arith.constant dense<0.000000e+00> : vector<16x256xf32>
    %5 = tpu.matmul %4, %1, %cst {dimension_numbers = #tpu.dot_dimension_numbers<[1], [0], [0], [1], [0, 0, 1, 1], [], []>} : vector<16x4xbf16>, vector<4x256xbf16>, vector<16x256xf32> -> vector<16x256xf32>
    %6 = vector.broadcast %3 : vector<1x256xf32> to vector<16x256xf32>
    %7 = arith.addf %5, %6 : vector<16x256xf32>
    %cst_6 = arith.constant 0.000000e+00 : f32
    %8 = vector.broadcast %cst_6 : f32 to vector<2x64xf32>
    %cst_7 = arith.constant 0.000000e+00 : f32
    %9 = vector.broadcast %cst_7 : f32 to vector<2x64xf32>
    %10 = vector.extract_strided_slice %7 {offsets = [0, 0], sizes = [2, 256], strides = [1, 1]} : vector<16x256xf32> to vector<2x256xf32>
    %11 = arith.truncf %8 : vector<2x64xf32> to vector<2x64xbf16>
    %cst_8 = arith.constant dense<0.000000e+00> : vector<2x256xf32>
    %12 = tpu.matmul %11, %2, %cst_8 {dimension_numbers = #tpu.dot_dimension_numbers<[1], [0], [0], [1], [0, 0, 1, 1], [], []>} : vector<2x64xbf16>, vector<64x256xbf16>, vector<2x256xf32> -> vector<2x256xf32>
    %13 = arith.addf %10, %12 : vector<2x256xf32>
    %14 = vector.extract_strided_slice %13 {offsets = [0, 0], sizes = [2, 192], strides = [1, 1]} : vector<2x256xf32> to vector<2x192xf32>
    %15 = arith.negf %14 : vector<2x192xf32>
    %16 = math.exp %15 : vector<2x192xf32>
    %cst_9 = arith.constant 1.000000e+00 : f32
    %17 = vector.broadcast %cst_9 : f32 to vector<2x192xf32>
    %18 = arith.addf %17, %16 : vector<2x192xf32>
    %19 = arith.divf %17, %18 : vector<2x192xf32>
    %20 = vector.extract_strided_slice %13 {offsets = [0, 192], sizes = [2, 64], strides = [1, 1]} : vector<2x256xf32> to vector<2x64xf32>
    %21 = math.tanh %20 : vector<2x64xf32>
    %22 = vector.extract_strided_slice %19 {offsets = [0, 64], sizes = [2, 64], strides = [1, 1]} : vector<2x192xf32> to vector<2x64xf32>
    %23 = arith.mulf %22, %9 : vector<2x64xf32>
    %24 = vector.extract_strided_slice %19 {offsets = [0, 0], sizes = [2, 64], strides = [1, 1]} : vector<2x192xf32> to vector<2x64xf32>
    %25 = arith.mulf %24, %21 : vector<2x64xf32>
    %26 = arith.addf %23, %25 : vector<2x64xf32>
    %27 = vector.extract_strided_slice %19 {offsets = [0, 128], sizes = [2, 64], strides = [1, 1]} : vector<2x192xf32> to vector<2x64xf32>
    %28 = math.tanh %26 : vector<2x64xf32>
    %29 = arith.mulf %27, %28 : vector<2x64xf32>
    %30 = vector.extract_strided_slice %7 {offsets = [2, 0], sizes = [2, 256], strides = [1, 1]} : vector<16x256xf32> to vector<2x256xf32>
    %31 = arith.truncf %29 : vector<2x64xf32> to vector<2x64xbf16>
    %cst_10 = arith.constant dense<0.000000e+00> : vector<2x256xf32>
    %32 = tpu.matmul %31, %2, %cst_10 {dimension_numbers = #tpu.dot_dimension_numbers<[1], [0], [0], [1], [0, 0, 1, 1], [], []>} : vector<2x64xbf16>, vector<64x256xbf16>, vector<2x256xf32> -> vector<2x256xf32>
    %33 = arith.addf %30, %32 : vector<2x256xf32>
    %34 = vector.extract_strided_slice %33 {offsets = [0, 0], sizes = [2, 192], strides = [1, 1]} : vector<2x256xf32> to vector<2x192xf32>
    %35 = arith.negf %34 : vector<2x192xf32>
    %36 = math.exp %35 : vector<2x192xf32>
    %cst_11 = arith.constant 1.000000e+00 : f32
    %37 = vector.broadcast %cst_11 : f32 to vector<2x192xf32>
    %38 = arith.addf %37, %36 : vector<2x192xf32>
    %39 = arith.divf %37, %38 : vector<2x192xf32>
    %40 = vector.extract_strided_slice %33 {offsets = [0, 192], sizes = [2, 64], strides = [1, 1]} : vector<2x256xf32> to vector<2x64xf32>
    %41 = math.tanh %40 : vector<2x64xf32>
    %42 = vector.extract_strided_slice %39 {offsets = [0, 64], sizes = [2, 64], strides = [1, 1]} : vector<2x192xf32> to vector<2x64xf32>
    %43 = arith.mulf %42, %26 : vector<2x64xf32>
    %44 = vector.extract_strided_slice %39 {offsets = [0, 0], sizes = [2, 64], strides = [1, 1]} : vector<2x192xf32> to vector<2x64xf32>
    %45 = arith.mulf %44, %41 : vector<2x64xf32>
    %46 = arith.addf %43, %45 : vector<2x64xf32>
    %47 = vector.extract_strided_slice %39 {offsets = [0, 128], sizes = [2, 64], strides = [1, 1]} : vector<2x192xf32> to vector<2x64xf32>
    %48 = math.tanh %46 : vector<2x64xf32>
    %49 = arith.mulf %47, %48 : vector<2x64xf32>
    %50 = vector.extract_strided_slice %7 {offsets = [4, 0], sizes = [2, 256], strides = [1, 1]} : vector<16x256xf32> to vector<2x256xf32>
    %51 = arith.truncf %49 : vector<2x64xf32> to vector<2x64xbf16>
    %cst_12 = arith.constant dense<0.000000e+00> : vector<2x256xf32>
    %52 = tpu.matmul %51, %2, %cst_12 {dimension_numbers = #tpu.dot_dimension_numbers<[1], [0], [0], [1], [0, 0, 1, 1], [], []>} : vector<2x64xbf16>, vector<64x256xbf16>, vector<2x256xf32> -> vector<2x256xf32>
    %53 = arith.addf %50, %52 : vector<2x256xf32>
    %54 = vector.extract_strided_slice %53 {offsets = [0, 0], sizes = [2, 192], strides = [1, 1]} : vector<2x256xf32> to vector<2x192xf32>
    %55 = arith.negf %54 : vector<2x192xf32>
    %56 = math.exp %55 : vector<2x192xf32>
    %cst_13 = arith.constant 1.000000e+00 : f32
    %57 = vector.broadcast %cst_13 : f32 to vector<2x192xf32>
    %58 = arith.addf %57, %56 : vector<2x192xf32>
    %59 = arith.divf %57, %58 : vector<2x192xf32>
    %60 = vector.extract_strided_slice %53 {offsets = [0, 192], sizes = [2, 64], strides = [1, 1]} : vector<2x256xf32> to vector<2x64xf32>
    %61 = math.tanh %60 : vector<2x64xf32>
    %62 = vector.extract_strided_slice %59 {offsets = [0, 64], sizes = [2, 64], strides = [1, 1]} : vector<2x192xf32> to vector<2x64xf32>
    %63 = arith.mulf %62, %46 : vector<2x64xf32>
    %64 = vector.extract_strided_slice %59 {offsets = [0, 0], sizes = [2, 64], strides = [1, 1]} : vector<2x192xf32> to vector<2x64xf32>
    %65 = arith.mulf %64, %61 : vector<2x64xf32>
    %66 = arith.addf %63, %65 : vector<2x64xf32>
    %67 = vector.extract_strided_slice %59 {offsets = [0, 128], sizes = [2, 64], strides = [1, 1]} : vector<2x192xf32> to vector<2x64xf32>
    %68 = math.tanh %66 : vector<2x64xf32>
    %69 = arith.mulf %67, %68 : vector<2x64xf32>
    %70 = vector.extract_strided_slice %7 {offsets = [6, 0], sizes = [2, 256], strides = [1, 1]} : vector<16x256xf32> to vector<2x256xf32>
    %71 = arith.truncf %69 : vector<2x64xf32> to vector<2x64xbf16>
    %cst_14 = arith.constant dense<0.000000e+00> : vector<2x256xf32>
    %72 = tpu.matmul %71, %2, %cst_14 {dimension_numbers = #tpu.dot_dimension_numbers<[1], [0], [0], [1], [0, 0, 1, 1], [], []>} : vector<2x64xbf16>, vector<64x256xbf16>, vector<2x256xf32> -> vector<2x256xf32>
    %73 = arith.addf %70, %72 : vector<2x256xf32>
    %74 = vector.extract_strided_slice %73 {offsets = [0, 0], sizes = [2, 192], strides = [1, 1]} : vector<2x256xf32> to vector<2x192xf32>
    %75 = arith.negf %74 : vector<2x192xf32>
    %76 = math.exp %75 : vector<2x192xf32>
    %cst_15 = arith.constant 1.000000e+00 : f32
    %77 = vector.broadcast %cst_15 : f32 to vector<2x192xf32>
    %78 = arith.addf %77, %76 : vector<2x192xf32>
    %79 = arith.divf %77, %78 : vector<2x192xf32>
    %80 = vector.extract_strided_slice %73 {offsets = [0, 192], sizes = [2, 64], strides = [1, 1]} : vector<2x256xf32> to vector<2x64xf32>
    %81 = math.tanh %80 : vector<2x64xf32>
    %82 = vector.extract_strided_slice %79 {offsets = [0, 64], sizes = [2, 64], strides = [1, 1]} : vector<2x192xf32> to vector<2x64xf32>
    %83 = arith.mulf %82, %66 : vector<2x64xf32>
    %84 = vector.extract_strided_slice %79 {offsets = [0, 0], sizes = [2, 64], strides = [1, 1]} : vector<2x192xf32> to vector<2x64xf32>
    %85 = arith.mulf %84, %81 : vector<2x64xf32>
    %86 = arith.addf %83, %85 : vector<2x64xf32>
    %87 = vector.extract_strided_slice %79 {offsets = [0, 128], sizes = [2, 64], strides = [1, 1]} : vector<2x192xf32> to vector<2x64xf32>
    %88 = math.tanh %86 : vector<2x64xf32>
    %89 = arith.mulf %87, %88 : vector<2x64xf32>
    %90 = vector.extract_strided_slice %7 {offsets = [8, 0], sizes = [2, 256], strides = [1, 1]} : vector<16x256xf32> to vector<2x256xf32>
    %91 = arith.truncf %89 : vector<2x64xf32> to vector<2x64xbf16>
    %cst_16 = arith.constant dense<0.000000e+00> : vector<2x256xf32>
    %92 = tpu.matmul %91, %2, %cst_16 {dimension_numbers = #tpu.dot_dimension_numbers<[1], [0], [0], [1], [0, 0, 1, 1], [], []>} : vector<2x64xbf16>, vector<64x256xbf16>, vector<2x256xf32> -> vector<2x256xf32>
    %93 = arith.addf %90, %92 : vector<2x256xf32>
    %94 = vector.extract_strided_slice %93 {offsets = [0, 0], sizes = [2, 192], strides = [1, 1]} : vector<2x256xf32> to vector<2x192xf32>
    %95 = arith.negf %94 : vector<2x192xf32>
    %96 = math.exp %95 : vector<2x192xf32>
    %cst_17 = arith.constant 1.000000e+00 : f32
    %97 = vector.broadcast %cst_17 : f32 to vector<2x192xf32>
    %98 = arith.addf %97, %96 : vector<2x192xf32>
    %99 = arith.divf %97, %98 : vector<2x192xf32>
    %100 = vector.extract_strided_slice %93 {offsets = [0, 192], sizes = [2, 64], strides = [1, 1]} : vector<2x256xf32> to vector<2x64xf32>
    %101 = math.tanh %100 : vector<2x64xf32>
    %102 = vector.extract_strided_slice %99 {offsets = [0, 64], sizes = [2, 64], strides = [1, 1]} : vector<2x192xf32> to vector<2x64xf32>
    %103 = arith.mulf %102, %86 : vector<2x64xf32>
    %104 = vector.extract_strided_slice %99 {offsets = [0, 0], sizes = [2, 64], strides = [1, 1]} : vector<2x192xf32> to vector<2x64xf32>
    %105 = arith.mulf %104, %101 : vector<2x64xf32>
    %106 = arith.addf %103, %105 : vector<2x64xf32>
    %107 = vector.extract_strided_slice %99 {offsets = [0, 128], sizes = [2, 64], strides = [1, 1]} : vector<2x192xf32> to vector<2x64xf32>
    %108 = math.tanh %106 : vector<2x64xf32>
    %109 = arith.mulf %107, %108 : vector<2x64xf32>
    %110 = vector.extract_strided_slice %7 {offsets = [10, 0], sizes = [2, 256], strides = [1, 1]} : vector<16x256xf32> to vector<2x256xf32>
    %111 = arith.truncf %109 : vector<2x64xf32> to vector<2x64xbf16>
    %cst_18 = arith.constant dense<0.000000e+00> : vector<2x256xf32>
    %112 = tpu.matmul %111, %2, %cst_18 {dimension_numbers = #tpu.dot_dimension_numbers<[1], [0], [0], [1], [0, 0, 1, 1], [], []>} : vector<2x64xbf16>, vector<64x256xbf16>, vector<2x256xf32> -> vector<2x256xf32>
    %113 = arith.addf %110, %112 : vector<2x256xf32>
    %114 = vector.extract_strided_slice %113 {offsets = [0, 0], sizes = [2, 192], strides = [1, 1]} : vector<2x256xf32> to vector<2x192xf32>
    %115 = arith.negf %114 : vector<2x192xf32>
    %116 = math.exp %115 : vector<2x192xf32>
    %cst_19 = arith.constant 1.000000e+00 : f32
    %117 = vector.broadcast %cst_19 : f32 to vector<2x192xf32>
    %118 = arith.addf %117, %116 : vector<2x192xf32>
    %119 = arith.divf %117, %118 : vector<2x192xf32>
    %120 = vector.extract_strided_slice %113 {offsets = [0, 192], sizes = [2, 64], strides = [1, 1]} : vector<2x256xf32> to vector<2x64xf32>
    %121 = math.tanh %120 : vector<2x64xf32>
    %122 = vector.extract_strided_slice %119 {offsets = [0, 64], sizes = [2, 64], strides = [1, 1]} : vector<2x192xf32> to vector<2x64xf32>
    %123 = arith.mulf %122, %106 : vector<2x64xf32>
    %124 = vector.extract_strided_slice %119 {offsets = [0, 0], sizes = [2, 64], strides = [1, 1]} : vector<2x192xf32> to vector<2x64xf32>
    %125 = arith.mulf %124, %121 : vector<2x64xf32>
    %126 = arith.addf %123, %125 : vector<2x64xf32>
    %127 = vector.extract_strided_slice %119 {offsets = [0, 128], sizes = [2, 64], strides = [1, 1]} : vector<2x192xf32> to vector<2x64xf32>
    %128 = math.tanh %126 : vector<2x64xf32>
    %129 = arith.mulf %127, %128 : vector<2x64xf32>
    %130 = vector.extract_strided_slice %7 {offsets = [12, 0], sizes = [2, 256], strides = [1, 1]} : vector<16x256xf32> to vector<2x256xf32>
    %131 = arith.truncf %129 : vector<2x64xf32> to vector<2x64xbf16>
    %cst_20 = arith.constant dense<0.000000e+00> : vector<2x256xf32>
    %132 = tpu.matmul %131, %2, %cst_20 {dimension_numbers = #tpu.dot_dimension_numbers<[1], [0], [0], [1], [0, 0, 1, 1], [], []>} : vector<2x64xbf16>, vector<64x256xbf16>, vector<2x256xf32> -> vector<2x256xf32>
    %133 = arith.addf %130, %132 : vector<2x256xf32>
    %134 = vector.extract_strided_slice %133 {offsets = [0, 0], sizes = [2, 192], strides = [1, 1]} : vector<2x256xf32> to vector<2x192xf32>
    %135 = arith.negf %134 : vector<2x192xf32>
    %136 = math.exp %135 : vector<2x192xf32>
    %cst_21 = arith.constant 1.000000e+00 : f32
    %137 = vector.broadcast %cst_21 : f32 to vector<2x192xf32>
    %138 = arith.addf %137, %136 : vector<2x192xf32>
    %139 = arith.divf %137, %138 : vector<2x192xf32>
    %140 = vector.extract_strided_slice %133 {offsets = [0, 192], sizes = [2, 64], strides = [1, 1]} : vector<2x256xf32> to vector<2x64xf32>
    %141 = math.tanh %140 : vector<2x64xf32>
    %142 = vector.extract_strided_slice %139 {offsets = [0, 64], sizes = [2, 64], strides = [1, 1]} : vector<2x192xf32> to vector<2x64xf32>
    %143 = arith.mulf %142, %126 : vector<2x64xf32>
    %144 = vector.extract_strided_slice %139 {offsets = [0, 0], sizes = [2, 64], strides = [1, 1]} : vector<2x192xf32> to vector<2x64xf32>
    %145 = arith.mulf %144, %141 : vector<2x64xf32>
    %146 = arith.addf %143, %145 : vector<2x64xf32>
    %147 = vector.extract_strided_slice %139 {offsets = [0, 128], sizes = [2, 64], strides = [1, 1]} : vector<2x192xf32> to vector<2x64xf32>
    %148 = math.tanh %146 : vector<2x64xf32>
    %149 = arith.mulf %147, %148 : vector<2x64xf32>
    %150 = vector.extract_strided_slice %7 {offsets = [14, 0], sizes = [2, 256], strides = [1, 1]} : vector<16x256xf32> to vector<2x256xf32>
    %151 = arith.truncf %149 : vector<2x64xf32> to vector<2x64xbf16>
    %cst_22 = arith.constant dense<0.000000e+00> : vector<2x256xf32>
    %152 = tpu.matmul %151, %2, %cst_22 {dimension_numbers = #tpu.dot_dimension_numbers<[1], [0], [0], [1], [0, 0, 1, 1], [], []>} : vector<2x64xbf16>, vector<64x256xbf16>, vector<2x256xf32> -> vector<2x256xf32>
    %153 = arith.addf %150, %152 : vector<2x256xf32>
    %154 = vector.extract_strided_slice %153 {offsets = [0, 0], sizes = [2, 192], strides = [1, 1]} : vector<2x256xf32> to vector<2x192xf32>
    %155 = arith.negf %154 : vector<2x192xf32>
    %156 = math.exp %155 : vector<2x192xf32>
    %cst_23 = arith.constant 1.000000e+00 : f32
    %157 = vector.broadcast %cst_23 : f32 to vector<2x192xf32>
    %158 = arith.addf %157, %156 : vector<2x192xf32>
    %159 = arith.divf %157, %158 : vector<2x192xf32>
    %160 = vector.extract_strided_slice %153 {offsets = [0, 192], sizes = [2, 64], strides = [1, 1]} : vector<2x256xf32> to vector<2x64xf32>
    %161 = math.tanh %160 : vector<2x64xf32>
    %162 = vector.extract_strided_slice %159 {offsets = [0, 64], sizes = [2, 64], strides = [1, 1]} : vector<2x192xf32> to vector<2x64xf32>
    %163 = arith.mulf %162, %146 : vector<2x64xf32>
    %164 = vector.extract_strided_slice %159 {offsets = [0, 0], sizes = [2, 64], strides = [1, 1]} : vector<2x192xf32> to vector<2x64xf32>
    %165 = arith.mulf %164, %161 : vector<2x64xf32>
    %166 = arith.addf %163, %165 : vector<2x64xf32>
    %167 = vector.extract_strided_slice %159 {offsets = [0, 128], sizes = [2, 64], strides = [1, 1]} : vector<2x192xf32> to vector<2x64xf32>
    %168 = math.tanh %166 : vector<2x64xf32>
    %169 = arith.mulf %167, %168 : vector<2x64xf32>
    %c0_24 = arith.constant 0 : index
    %c0_25 = arith.constant 0 : index
    %170 = vector.load %arg1[%c0_24, %c0_25] : memref<16x4xf32, #tpu.memory_space<vmem>>, vector<16x4xf32>
    %c0_26 = arith.constant 0 : index
    %c0_27 = arith.constant 0 : index
    %171 = vector.load %arg5[%c0_26, %c0_27] : memref<112x128xbf16, #tpu.memory_space<vmem>>, vector<4x128xbf16>
    %c16_28 = arith.constant 16 : index
    %c0_29 = arith.constant 0 : index
    %172 = vector.load %arg5[%c16_28, %c0_29] : memref<112x128xbf16, #tpu.memory_space<vmem>>, vector<32x128xbf16>
    %c0_30 = arith.constant 0 : index
    %c0_31 = arith.constant 0 : index
    %173 = vector.load %arg6[%c0_30, %c0_31] : memref<2x128xf32, #tpu.memory_space<vmem>>, vector<1x128xf32>
    %174 = arith.truncf %170 : vector<16x4xf32> to vector<16x4xbf16>
    %cst_32 = arith.constant dense<0.000000e+00> : vector<16x128xf32>
    %175 = tpu.matmul %174, %171, %cst_32 {dimension_numbers = #tpu.dot_dimension_numbers<[1], [0], [0], [1], [0, 0, 1, 1], [], []>} : vector<16x4xbf16>, vector<4x128xbf16>, vector<16x128xf32> -> vector<16x128xf32>
    %176 = vector.broadcast %173 : vector<1x128xf32> to vector<16x128xf32>
    %177 = arith.addf %175, %176 : vector<16x128xf32>
    %cst_33 = arith.constant 0.000000e+00 : f32
    %178 = vector.broadcast %cst_33 : f32 to vector<2x32xf32>
    %cst_34 = arith.constant 0.000000e+00 : f32
    %179 = vector.broadcast %cst_34 : f32 to vector<2x32xf32>
    %180 = vector.extract_strided_slice %177 {offsets = [0, 0], sizes = [2, 128], strides = [1, 1]} : vector<16x128xf32> to vector<2x128xf32>
    %181 = arith.truncf %178 : vector<2x32xf32> to vector<2x32xbf16>
    %cst_35 = arith.constant dense<0.000000e+00> : vector<2x128xf32>
    %182 = tpu.matmul %181, %172, %cst_35 {dimension_numbers = #tpu.dot_dimension_numbers<[1], [0], [0], [1], [0, 0, 1, 1], [], []>} : vector<2x32xbf16>, vector<32x128xbf16>, vector<2x128xf32> -> vector<2x128xf32>
    %183 = arith.addf %180, %182 : vector<2x128xf32>
    %184 = vector.extract_strided_slice %183 {offsets = [0, 0], sizes = [2, 96], strides = [1, 1]} : vector<2x128xf32> to vector<2x96xf32>
    %185 = arith.negf %184 : vector<2x96xf32>
    %186 = math.exp %185 : vector<2x96xf32>
    %cst_36 = arith.constant 1.000000e+00 : f32
    %187 = vector.broadcast %cst_36 : f32 to vector<2x96xf32>
    %188 = arith.addf %187, %186 : vector<2x96xf32>
    %189 = arith.divf %187, %188 : vector<2x96xf32>
    %190 = vector.extract_strided_slice %183 {offsets = [0, 96], sizes = [2, 32], strides = [1, 1]} : vector<2x128xf32> to vector<2x32xf32>
    %191 = math.tanh %190 : vector<2x32xf32>
    %192 = vector.extract_strided_slice %189 {offsets = [0, 32], sizes = [2, 32], strides = [1, 1]} : vector<2x96xf32> to vector<2x32xf32>
    %193 = arith.mulf %192, %179 : vector<2x32xf32>
    %194 = vector.extract_strided_slice %189 {offsets = [0, 0], sizes = [2, 32], strides = [1, 1]} : vector<2x96xf32> to vector<2x32xf32>
    %195 = arith.mulf %194, %191 : vector<2x32xf32>
    %196 = arith.addf %193, %195 : vector<2x32xf32>
    %197 = vector.extract_strided_slice %189 {offsets = [0, 64], sizes = [2, 32], strides = [1, 1]} : vector<2x96xf32> to vector<2x32xf32>
    %198 = math.tanh %196 : vector<2x32xf32>
    %199 = arith.mulf %197, %198 : vector<2x32xf32>
    %c0_37 = arith.constant 0 : index
    %c0_38 = arith.constant 0 : index
    %200 = vector.load %arg10[%c0_37, %c0_38] : memref<16x32xf32, #tpu.memory_space<vmem>>, vector<2x32xf32>
    tpu.vector_store %arg10[%c0_37, %c0_38], %199 {strides = array<i32>} : memref<16x32xf32, #tpu.memory_space<vmem>>, vector<2x32xf32>,
    %201 = vector.extract_strided_slice %177 {offsets = [2, 0], sizes = [2, 128], strides = [1, 1]} : vector<16x128xf32> to vector<2x128xf32>
    %202 = arith.truncf %199 : vector<2x32xf32> to vector<2x32xbf16>
    %cst_39 = arith.constant dense<0.000000e+00> : vector<2x128xf32>
    %203 = tpu.matmul %202, %172, %cst_39 {dimension_numbers = #tpu.dot_dimension_numbers<[1], [0], [0], [1], [0, 0, 1, 1], [], []>} : vector<2x32xbf16>, vector<32x128xbf16>, vector<2x128xf32> -> vector<2x128xf32>
    %204 = arith.addf %201, %203 : vector<2x128xf32>
    %205 = vector.extract_strided_slice %204 {offsets = [0, 0], sizes = [2, 96], strides = [1, 1]} : vector<2x128xf32> to vector<2x96xf32>
    %206 = arith.negf %205 : vector<2x96xf32>
    %207 = math.exp %206 : vector<2x96xf32>
    %cst_40 = arith.constant 1.000000e+00 : f32
    %208 = vector.broadcast %cst_40 : f32 to vector<2x96xf32>
    %209 = arith.addf %208, %207 : vector<2x96xf32>
    %210 = arith.divf %208, %209 : vector<2x96xf32>
    %211 = vector.extract_strided_slice %204 {offsets = [0, 96], sizes = [2, 32], strides = [1, 1]} : vector<2x128xf32> to vector<2x32xf32>
    %212 = math.tanh %211 : vector<2x32xf32>
    %213 = vector.extract_strided_slice %210 {offsets = [0, 32], sizes = [2, 32], strides = [1, 1]} : vector<2x96xf32> to vector<2x32xf32>
    %214 = arith.mulf %213, %196 : vector<2x32xf32>
    %215 = vector.extract_strided_slice %210 {offsets = [0, 0], sizes = [2, 32], strides = [1, 1]} : vector<2x96xf32> to vector<2x32xf32>
    %216 = arith.mulf %215, %212 : vector<2x32xf32>
    %217 = arith.addf %214, %216 : vector<2x32xf32>
    %218 = vector.extract_strided_slice %210 {offsets = [0, 64], sizes = [2, 32], strides = [1, 1]} : vector<2x96xf32> to vector<2x32xf32>
    %219 = math.tanh %217 : vector<2x32xf32>
    %220 = arith.mulf %218, %219 : vector<2x32xf32>
    %c2 = arith.constant 2 : index
    %c0_41 = arith.constant 0 : index
    %221 = vector.load %arg10[%c2, %c0_41] : memref<16x32xf32, #tpu.memory_space<vmem>>, vector<2x32xf32>
    tpu.vector_store %arg10[%c2, %c0_41], %220 {strides = array<i32>} : memref<16x32xf32, #tpu.memory_space<vmem>>, vector<2x32xf32>,
    %222 = vector.extract_strided_slice %177 {offsets = [4, 0], sizes = [2, 128], strides = [1, 1]} : vector<16x128xf32> to vector<2x128xf32>
    %223 = arith.truncf %220 : vector<2x32xf32> to vector<2x32xbf16>
    %cst_42 = arith.constant dense<0.000000e+00> : vector<2x128xf32>
    %224 = tpu.matmul %223, %172, %cst_42 {dimension_numbers = #tpu.dot_dimension_numbers<[1], [0], [0], [1], [0, 0, 1, 1], [], []>} : vector<2x32xbf16>, vector<32x128xbf16>, vector<2x128xf32> -> vector<2x128xf32>
    %225 = arith.addf %222, %224 : vector<2x128xf32>
    %226 = vector.extract_strided_slice %225 {offsets = [0, 0], sizes = [2, 96], strides = [1, 1]} : vector<2x128xf32> to vector<2x96xf32>
    %227 = arith.negf %226 : vector<2x96xf32>
    %228 = math.exp %227 : vector<2x96xf32>
    %cst_43 = arith.constant 1.000000e+00 : f32
    %229 = vector.broadcast %cst_43 : f32 to vector<2x96xf32>
    %230 = arith.addf %229, %228 : vector<2x96xf32>
    %231 = arith.divf %229, %230 : vector<2x96xf32>
    %232 = vector.extract_strided_slice %225 {offsets = [0, 96], sizes = [2, 32], strides = [1, 1]} : vector<2x128xf32> to vector<2x32xf32>
    %233 = math.tanh %232 : vector<2x32xf32>
    %234 = vector.extract_strided_slice %231 {offsets = [0, 32], sizes = [2, 32], strides = [1, 1]} : vector<2x96xf32> to vector<2x32xf32>
    %235 = arith.mulf %234, %217 : vector<2x32xf32>
    %236 = vector.extract_strided_slice %231 {offsets = [0, 0], sizes = [2, 32], strides = [1, 1]} : vector<2x96xf32> to vector<2x32xf32>
    %237 = arith.mulf %236, %233 : vector<2x32xf32>
    %238 = arith.addf %235, %237 : vector<2x32xf32>
    %239 = vector.extract_strided_slice %231 {offsets = [0, 64], sizes = [2, 32], strides = [1, 1]} : vector<2x96xf32> to vector<2x32xf32>
    %240 = math.tanh %238 : vector<2x32xf32>
    %241 = arith.mulf %239, %240 : vector<2x32xf32>
    %c4 = arith.constant 4 : index
    %c0_44 = arith.constant 0 : index
    %242 = vector.load %arg10[%c4, %c0_44] : memref<16x32xf32, #tpu.memory_space<vmem>>, vector<2x32xf32>
    tpu.vector_store %arg10[%c4, %c0_44], %241 {strides = array<i32>} : memref<16x32xf32, #tpu.memory_space<vmem>>, vector<2x32xf32>,
    %243 = vector.extract_strided_slice %177 {offsets = [6, 0], sizes = [2, 128], strides = [1, 1]} : vector<16x128xf32> to vector<2x128xf32>
    %244 = arith.truncf %241 : vector<2x32xf32> to vector<2x32xbf16>
    %cst_45 = arith.constant dense<0.000000e+00> : vector<2x128xf32>
    %245 = tpu.matmul %244, %172, %cst_45 {dimension_numbers = #tpu.dot_dimension_numbers<[1], [0], [0], [1], [0, 0, 1, 1], [], []>} : vector<2x32xbf16>, vector<32x128xbf16>, vector<2x128xf32> -> vector<2x128xf32>
    %246 = arith.addf %243, %245 : vector<2x128xf32>
    %247 = vector.extract_strided_slice %246 {offsets = [0, 0], sizes = [2, 96], strides = [1, 1]} : vector<2x128xf32> to vector<2x96xf32>
    %248 = arith.negf %247 : vector<2x96xf32>
    %249 = math.exp %248 : vector<2x96xf32>
    %cst_46 = arith.constant 1.000000e+00 : f32
    %250 = vector.broadcast %cst_46 : f32 to vector<2x96xf32>
    %251 = arith.addf %250, %249 : vector<2x96xf32>
    %252 = arith.divf %250, %251 : vector<2x96xf32>
    %253 = vector.extract_strided_slice %246 {offsets = [0, 96], sizes = [2, 32], strides = [1, 1]} : vector<2x128xf32> to vector<2x32xf32>
    %254 = math.tanh %253 : vector<2x32xf32>
    %255 = vector.extract_strided_slice %252 {offsets = [0, 32], sizes = [2, 32], strides = [1, 1]} : vector<2x96xf32> to vector<2x32xf32>
    %256 = arith.mulf %255, %238 : vector<2x32xf32>
    %257 = vector.extract_strided_slice %252 {offsets = [0, 0], sizes = [2, 32], strides = [1, 1]} : vector<2x96xf32> to vector<2x32xf32>
    %258 = arith.mulf %257, %254 : vector<2x32xf32>
    %259 = arith.addf %256, %258 : vector<2x32xf32>
    %260 = vector.extract_strided_slice %252 {offsets = [0, 64], sizes = [2, 32], strides = [1, 1]} : vector<2x96xf32> to vector<2x32xf32>
    %261 = math.tanh %259 : vector<2x32xf32>
    %262 = arith.mulf %260, %261 : vector<2x32xf32>
    %c6 = arith.constant 6 : index
    %c0_47 = arith.constant 0 : index
    %263 = vector.load %arg10[%c6, %c0_47] : memref<16x32xf32, #tpu.memory_space<vmem>>, vector<2x32xf32>
    tpu.vector_store %arg10[%c6, %c0_47], %262 {strides = array<i32>} : memref<16x32xf32, #tpu.memory_space<vmem>>, vector<2x32xf32>,
    %264 = vector.extract_strided_slice %177 {offsets = [8, 0], sizes = [2, 128], strides = [1, 1]} : vector<16x128xf32> to vector<2x128xf32>
    %265 = arith.truncf %262 : vector<2x32xf32> to vector<2x32xbf16>
    %cst_48 = arith.constant dense<0.000000e+00> : vector<2x128xf32>
    %266 = tpu.matmul %265, %172, %cst_48 {dimension_numbers = #tpu.dot_dimension_numbers<[1], [0], [0], [1], [0, 0, 1, 1], [], []>} : vector<2x32xbf16>, vector<32x128xbf16>, vector<2x128xf32> -> vector<2x128xf32>
    %267 = arith.addf %264, %266 : vector<2x128xf32>
    %268 = vector.extract_strided_slice %267 {offsets = [0, 0], sizes = [2, 96], strides = [1, 1]} : vector<2x128xf32> to vector<2x96xf32>
    %269 = arith.negf %268 : vector<2x96xf32>
    %270 = math.exp %269 : vector<2x96xf32>
    %cst_49 = arith.constant 1.000000e+00 : f32
    %271 = vector.broadcast %cst_49 : f32 to vector<2x96xf32>
    %272 = arith.addf %271, %270 : vector<2x96xf32>
    %273 = arith.divf %271, %272 : vector<2x96xf32>
    %274 = vector.extract_strided_slice %267 {offsets = [0, 96], sizes = [2, 32], strides = [1, 1]} : vector<2x128xf32> to vector<2x32xf32>
    %275 = math.tanh %274 : vector<2x32xf32>
    %276 = vector.extract_strided_slice %273 {offsets = [0, 32], sizes = [2, 32], strides = [1, 1]} : vector<2x96xf32> to vector<2x32xf32>
    %277 = arith.mulf %276, %259 : vector<2x32xf32>
    %278 = vector.extract_strided_slice %273 {offsets = [0, 0], sizes = [2, 32], strides = [1, 1]} : vector<2x96xf32> to vector<2x32xf32>
    %279 = arith.mulf %278, %275 : vector<2x32xf32>
    %280 = arith.addf %277, %279 : vector<2x32xf32>
    %281 = vector.extract_strided_slice %273 {offsets = [0, 64], sizes = [2, 32], strides = [1, 1]} : vector<2x96xf32> to vector<2x32xf32>
    %282 = math.tanh %280 : vector<2x32xf32>
    %283 = arith.mulf %281, %282 : vector<2x32xf32>
    %c8 = arith.constant 8 : index
    %c0_50 = arith.constant 0 : index
    %284 = vector.load %arg10[%c8, %c0_50] : memref<16x32xf32, #tpu.memory_space<vmem>>, vector<2x32xf32>
    tpu.vector_store %arg10[%c8, %c0_50], %283 {strides = array<i32>} : memref<16x32xf32, #tpu.memory_space<vmem>>, vector<2x32xf32>,
    %285 = vector.extract_strided_slice %177 {offsets = [10, 0], sizes = [2, 128], strides = [1, 1]} : vector<16x128xf32> to vector<2x128xf32>
    %286 = arith.truncf %283 : vector<2x32xf32> to vector<2x32xbf16>
    %cst_51 = arith.constant dense<0.000000e+00> : vector<2x128xf32>
    %287 = tpu.matmul %286, %172, %cst_51 {dimension_numbers = #tpu.dot_dimension_numbers<[1], [0], [0], [1], [0, 0, 1, 1], [], []>} : vector<2x32xbf16>, vector<32x128xbf16>, vector<2x128xf32> -> vector<2x128xf32>
    %288 = arith.addf %285, %287 : vector<2x128xf32>
    %289 = vector.extract_strided_slice %288 {offsets = [0, 0], sizes = [2, 96], strides = [1, 1]} : vector<2x128xf32> to vector<2x96xf32>
    %290 = arith.negf %289 : vector<2x96xf32>
    %291 = math.exp %290 : vector<2x96xf32>
    %cst_52 = arith.constant 1.000000e+00 : f32
    %292 = vector.broadcast %cst_52 : f32 to vector<2x96xf32>
    %293 = arith.addf %292, %291 : vector<2x96xf32>
    %294 = arith.divf %292, %293 : vector<2x96xf32>
    %295 = vector.extract_strided_slice %288 {offsets = [0, 96], sizes = [2, 32], strides = [1, 1]} : vector<2x128xf32> to vector<2x32xf32>
    %296 = math.tanh %295 : vector<2x32xf32>
    %297 = vector.extract_strided_slice %294 {offsets = [0, 32], sizes = [2, 32], strides = [1, 1]} : vector<2x96xf32> to vector<2x32xf32>
    %298 = arith.mulf %297, %280 : vector<2x32xf32>
    %299 = vector.extract_strided_slice %294 {offsets = [0, 0], sizes = [2, 32], strides = [1, 1]} : vector<2x96xf32> to vector<2x32xf32>
    %300 = arith.mulf %299, %296 : vector<2x32xf32>
    %301 = arith.addf %298, %300 : vector<2x32xf32>
    %302 = vector.extract_strided_slice %294 {offsets = [0, 64], sizes = [2, 32], strides = [1, 1]} : vector<2x96xf32> to vector<2x32xf32>
    %303 = math.tanh %301 : vector<2x32xf32>
    %304 = arith.mulf %302, %303 : vector<2x32xf32>
    %c10 = arith.constant 10 : index
    %c0_53 = arith.constant 0 : index
    %305 = vector.load %arg10[%c10, %c0_53] : memref<16x32xf32, #tpu.memory_space<vmem>>, vector<2x32xf32>
    tpu.vector_store %arg10[%c10, %c0_53], %304 {strides = array<i32>} : memref<16x32xf32, #tpu.memory_space<vmem>>, vector<2x32xf32>,
    %306 = vector.extract_strided_slice %177 {offsets = [12, 0], sizes = [2, 128], strides = [1, 1]} : vector<16x128xf32> to vector<2x128xf32>
    %307 = arith.truncf %304 : vector<2x32xf32> to vector<2x32xbf16>
    %cst_54 = arith.constant dense<0.000000e+00> : vector<2x128xf32>
    %308 = tpu.matmul %307, %172, %cst_54 {dimension_numbers = #tpu.dot_dimension_numbers<[1], [0], [0], [1], [0, 0, 1, 1], [], []>} : vector<2x32xbf16>, vector<32x128xbf16>, vector<2x128xf32> -> vector<2x128xf32>
    %309 = arith.addf %306, %308 : vector<2x128xf32>
    %310 = vector.extract_strided_slice %309 {offsets = [0, 0], sizes = [2, 96], strides = [1, 1]} : vector<2x128xf32> to vector<2x96xf32>
    %311 = arith.negf %310 : vector<2x96xf32>
    %312 = math.exp %311 : vector<2x96xf32>
    %cst_55 = arith.constant 1.000000e+00 : f32
    %313 = vector.broadcast %cst_55 : f32 to vector<2x96xf32>
    %314 = arith.addf %313, %312 : vector<2x96xf32>
    %315 = arith.divf %313, %314 : vector<2x96xf32>
    %316 = vector.extract_strided_slice %309 {offsets = [0, 96], sizes = [2, 32], strides = [1, 1]} : vector<2x128xf32> to vector<2x32xf32>
    %317 = math.tanh %316 : vector<2x32xf32>
    %318 = vector.extract_strided_slice %315 {offsets = [0, 32], sizes = [2, 32], strides = [1, 1]} : vector<2x96xf32> to vector<2x32xf32>
    %319 = arith.mulf %318, %301 : vector<2x32xf32>
    %320 = vector.extract_strided_slice %315 {offsets = [0, 0], sizes = [2, 32], strides = [1, 1]} : vector<2x96xf32> to vector<2x32xf32>
    %321 = arith.mulf %320, %317 : vector<2x32xf32>
    %322 = arith.addf %319, %321 : vector<2x32xf32>
    %323 = vector.extract_strided_slice %315 {offsets = [0, 64], sizes = [2, 32], strides = [1, 1]} : vector<2x96xf32> to vector<2x32xf32>
    %324 = math.tanh %322 : vector<2x32xf32>
    %325 = arith.mulf %323, %324 : vector<2x32xf32>
    %c12 = arith.constant 12 : index
    %c0_56 = arith.constant 0 : index
    %326 = vector.load %arg10[%c12, %c0_56] : memref<16x32xf32, #tpu.memory_space<vmem>>, vector<2x32xf32>
    tpu.vector_store %arg10[%c12, %c0_56], %325 {strides = array<i32>} : memref<16x32xf32, #tpu.memory_space<vmem>>, vector<2x32xf32>,
    %327 = vector.extract_strided_slice %177 {offsets = [14, 0], sizes = [2, 128], strides = [1, 1]} : vector<16x128xf32> to vector<2x128xf32>
    %328 = arith.truncf %325 : vector<2x32xf32> to vector<2x32xbf16>
    %cst_57 = arith.constant dense<0.000000e+00> : vector<2x128xf32>
    %329 = tpu.matmul %328, %172, %cst_57 {dimension_numbers = #tpu.dot_dimension_numbers<[1], [0], [0], [1], [0, 0, 1, 1], [], []>} : vector<2x32xbf16>, vector<32x128xbf16>, vector<2x128xf32> -> vector<2x128xf32>
    %330 = arith.addf %327, %329 : vector<2x128xf32>
    %331 = vector.extract_strided_slice %330 {offsets = [0, 0], sizes = [2, 96], strides = [1, 1]} : vector<2x128xf32> to vector<2x96xf32>
    %332 = arith.negf %331 : vector<2x96xf32>
    %333 = math.exp %332 : vector<2x96xf32>
    %cst_58 = arith.constant 1.000000e+00 : f32
    %334 = vector.broadcast %cst_58 : f32 to vector<2x96xf32>
    %335 = arith.addf %334, %333 : vector<2x96xf32>
    %336 = arith.divf %334, %335 : vector<2x96xf32>
    %337 = vector.extract_strided_slice %330 {offsets = [0, 96], sizes = [2, 32], strides = [1, 1]} : vector<2x128xf32> to vector<2x32xf32>
    %338 = math.tanh %337 : vector<2x32xf32>
    %339 = vector.extract_strided_slice %336 {offsets = [0, 32], sizes = [2, 32], strides = [1, 1]} : vector<2x96xf32> to vector<2x32xf32>
    %340 = arith.mulf %339, %322 : vector<2x32xf32>
    %341 = vector.extract_strided_slice %336 {offsets = [0, 0], sizes = [2, 32], strides = [1, 1]} : vector<2x96xf32> to vector<2x32xf32>
    %342 = arith.mulf %341, %338 : vector<2x32xf32>
    %343 = arith.addf %340, %342 : vector<2x32xf32>
    %344 = vector.extract_strided_slice %336 {offsets = [0, 64], sizes = [2, 32], strides = [1, 1]} : vector<2x96xf32> to vector<2x32xf32>
    %345 = math.tanh %343 : vector<2x32xf32>
    %346 = arith.mulf %344, %345 : vector<2x32xf32>
    %c14 = arith.constant 14 : index
    %c0_59 = arith.constant 0 : index
    %347 = vector.load %arg10[%c14, %c0_59] : memref<16x32xf32, #tpu.memory_space<vmem>>, vector<2x32xf32>
    tpu.vector_store %arg10[%c14, %c0_59], %346 {strides = array<i32>} : memref<16x32xf32, #tpu.memory_space<vmem>>, vector<2x32xf32>,
    %c0_60 = arith.constant 0 : index
    %c0_61 = arith.constant 0 : index
    %348 = vector.load %arg10[%c0_60, %c0_61] : memref<16x32xf32, #tpu.memory_space<vmem>>, vector<16x32xf32>
    %c48 = arith.constant 48 : index
    %c0_62 = arith.constant 0 : index
    %349 = vector.load %arg5[%c48, %c0_62] : memref<112x128xbf16, #tpu.memory_space<vmem>>, vector<32x128xbf16>
    %c80 = arith.constant 80 : index
    %c0_63 = arith.constant 0 : index
    %350 = vector.load %arg5[%c80, %c0_63] : memref<112x128xbf16, #tpu.memory_space<vmem>>, vector<32x128xbf16>
    %c1 = arith.constant 1 : index
    %c0_64 = arith.constant 0 : index
    %351 = vector.load %arg6[%c1, %c0_64] : memref<2x128xf32, #tpu.memory_space<vmem>>, vector<1x128xf32>
    %352 = arith.truncf %348 : vector<16x32xf32> to vector<16x32xbf16>
    %cst_65 = arith.constant dense<0.000000e+00> : vector<16x128xf32>
    %353 = tpu.matmul %352, %349, %cst_65 {dimension_numbers = #tpu.dot_dimension_numbers<[1], [0], [0], [1], [0, 0, 1, 1], [], []>} : vector<16x32xbf16>, vector<32x128xbf16>, vector<16x128xf32> -> vector<16x128xf32>
    %354 = vector.broadcast %351 : vector<1x128xf32> to vector<16x128xf32>
    %355 = arith.addf %353, %354 : vector<16x128xf32>
    %cst_66 = arith.constant 0.000000e+00 : f32
    %356 = vector.broadcast %cst_66 : f32 to vector<2x32xf32>
    %cst_67 = arith.constant 0.000000e+00 : f32
    %357 = vector.broadcast %cst_67 : f32 to vector<2x32xf32>
    %358 = vector.extract_strided_slice %355 {offsets = [0, 0], sizes = [2, 128], strides = [1, 1]} : vector<16x128xf32> to vector<2x128xf32>
    %359 = arith.truncf %356 : vector<2x32xf32> to vector<2x32xbf16>
    %cst_68 = arith.constant dense<0.000000e+00> : vector<2x128xf32>
    %360 = tpu.matmul %359, %350, %cst_68 {dimension_numbers = #tpu.dot_dimension_numbers<[1], [0], [0], [1], [0, 0, 1, 1], [], []>} : vector<2x32xbf16>, vector<32x128xbf16>, vector<2x128xf32> -> vector<2x128xf32>
    %361 = arith.addf %358, %360 : vector<2x128xf32>
    %362 = vector.extract_strided_slice %361 {offsets = [0, 0], sizes = [2, 96], strides = [1, 1]} : vector<2x128xf32> to vector<2x96xf32>
    %363 = arith.negf %362 : vector<2x96xf32>
    %364 = math.exp %363 : vector<2x96xf32>
    %cst_69 = arith.constant 1.000000e+00 : f32
    %365 = vector.broadcast %cst_69 : f32 to vector<2x96xf32>
    %366 = arith.addf %365, %364 : vector<2x96xf32>
    %367 = arith.divf %365, %366 : vector<2x96xf32>
    %368 = vector.extract_strided_slice %361 {offsets = [0, 96], sizes = [2, 32], strides = [1, 1]} : vector<2x128xf32> to vector<2x32xf32>
    %369 = math.tanh %368 : vector<2x32xf32>
    %370 = vector.extract_strided_slice %367 {offsets = [0, 32], sizes = [2, 32], strides = [1, 1]} : vector<2x96xf32> to vector<2x32xf32>
    %371 = arith.mulf %370, %357 : vector<2x32xf32>
    %372 = vector.extract_strided_slice %367 {offsets = [0, 0], sizes = [2, 32], strides = [1, 1]} : vector<2x96xf32> to vector<2x32xf32>
    %373 = arith.mulf %372, %369 : vector<2x32xf32>
    %374 = arith.addf %371, %373 : vector<2x32xf32>
    %375 = vector.extract_strided_slice %367 {offsets = [0, 64], sizes = [2, 32], strides = [1, 1]} : vector<2x96xf32> to vector<2x32xf32>
    %376 = math.tanh %374 : vector<2x32xf32>
    %377 = arith.mulf %375, %376 : vector<2x32xf32>
    %378 = vector.extract_strided_slice %355 {offsets = [2, 0], sizes = [2, 128], strides = [1, 1]} : vector<16x128xf32> to vector<2x128xf32>
    %379 = arith.truncf %377 : vector<2x32xf32> to vector<2x32xbf16>
    %cst_70 = arith.constant dense<0.000000e+00> : vector<2x128xf32>
    %380 = tpu.matmul %379, %350, %cst_70 {dimension_numbers = #tpu.dot_dimension_numbers<[1], [0], [0], [1], [0, 0, 1, 1], [], []>} : vector<2x32xbf16>, vector<32x128xbf16>, vector<2x128xf32> -> vector<2x128xf32>
    %381 = arith.addf %378, %380 : vector<2x128xf32>
    %382 = vector.extract_strided_slice %381 {offsets = [0, 0], sizes = [2, 96], strides = [1, 1]} : vector<2x128xf32> to vector<2x96xf32>
    %383 = arith.negf %382 : vector<2x96xf32>
    %384 = math.exp %383 : vector<2x96xf32>
    %cst_71 = arith.constant 1.000000e+00 : f32
    %385 = vector.broadcast %cst_71 : f32 to vector<2x96xf32>
    %386 = arith.addf %385, %384 : vector<2x96xf32>
    %387 = arith.divf %385, %386 : vector<2x96xf32>
    %388 = vector.extract_strided_slice %381 {offsets = [0, 96], sizes = [2, 32], strides = [1, 1]} : vector<2x128xf32> to vector<2x32xf32>
    %389 = math.tanh %388 : vector<2x32xf32>
    %390 = vector.extract_strided_slice %387 {offsets = [0, 32], sizes = [2, 32], strides = [1, 1]} : vector<2x96xf32> to vector<2x32xf32>
    %391 = arith.mulf %390, %374 : vector<2x32xf32>
    %392 = vector.extract_strided_slice %387 {offsets = [0, 0], sizes = [2, 32], strides = [1, 1]} : vector<2x96xf32> to vector<2x32xf32>
    %393 = arith.mulf %392, %389 : vector<2x32xf32>
    %394 = arith.addf %391, %393 : vector<2x32xf32>
    %395 = vector.extract_strided_slice %387 {offsets = [0, 64], sizes = [2, 32], strides = [1, 1]} : vector<2x96xf32> to vector<2x32xf32>
    %396 = math.tanh %394 : vector<2x32xf32>
    %397 = arith.mulf %395, %396 : vector<2x32xf32>
    %398 = vector.extract_strided_slice %355 {offsets = [4, 0], sizes = [2, 128], strides = [1, 1]} : vector<16x128xf32> to vector<2x128xf32>
    %399 = arith.truncf %397 : vector<2x32xf32> to vector<2x32xbf16>
    %cst_72 = arith.constant dense<0.000000e+00> : vector<2x128xf32>
    %400 = tpu.matmul %399, %350, %cst_72 {dimension_numbers = #tpu.dot_dimension_numbers<[1], [0], [0], [1], [0, 0, 1, 1], [], []>} : vector<2x32xbf16>, vector<32x128xbf16>, vector<2x128xf32> -> vector<2x128xf32>
    %401 = arith.addf %398, %400 : vector<2x128xf32>
    %402 = vector.extract_strided_slice %401 {offsets = [0, 0], sizes = [2, 96], strides = [1, 1]} : vector<2x128xf32> to vector<2x96xf32>
    %403 = arith.negf %402 : vector<2x96xf32>
    %404 = math.exp %403 : vector<2x96xf32>
    %cst_73 = arith.constant 1.000000e+00 : f32
    %405 = vector.broadcast %cst_73 : f32 to vector<2x96xf32>
    %406 = arith.addf %405, %404 : vector<2x96xf32>
    %407 = arith.divf %405, %406 : vector<2x96xf32>
    %408 = vector.extract_strided_slice %401 {offsets = [0, 96], sizes = [2, 32], strides = [1, 1]} : vector<2x128xf32> to vector<2x32xf32>
    %409 = math.tanh %408 : vector<2x32xf32>
    %410 = vector.extract_strided_slice %407 {offsets = [0, 32], sizes = [2, 32], strides = [1, 1]} : vector<2x96xf32> to vector<2x32xf32>
    %411 = arith.mulf %410, %394 : vector<2x32xf32>
    %412 = vector.extract_strided_slice %407 {offsets = [0, 0], sizes = [2, 32], strides = [1, 1]} : vector<2x96xf32> to vector<2x32xf32>
    %413 = arith.mulf %412, %409 : vector<2x32xf32>
    %414 = arith.addf %411, %413 : vector<2x32xf32>
    %415 = vector.extract_strided_slice %407 {offsets = [0, 64], sizes = [2, 32], strides = [1, 1]} : vector<2x96xf32> to vector<2x32xf32>
    %416 = math.tanh %414 : vector<2x32xf32>
    %417 = arith.mulf %415, %416 : vector<2x32xf32>
    %418 = vector.extract_strided_slice %355 {offsets = [6, 0], sizes = [2, 128], strides = [1, 1]} : vector<16x128xf32> to vector<2x128xf32>
    %419 = arith.truncf %417 : vector<2x32xf32> to vector<2x32xbf16>
    %cst_74 = arith.constant dense<0.000000e+00> : vector<2x128xf32>
    %420 = tpu.matmul %419, %350, %cst_74 {dimension_numbers = #tpu.dot_dimension_numbers<[1], [0], [0], [1], [0, 0, 1, 1], [], []>} : vector<2x32xbf16>, vector<32x128xbf16>, vector<2x128xf32> -> vector<2x128xf32>
    %421 = arith.addf %418, %420 : vector<2x128xf32>
    %422 = vector.extract_strided_slice %421 {offsets = [0, 0], sizes = [2, 96], strides = [1, 1]} : vector<2x128xf32> to vector<2x96xf32>
    %423 = arith.negf %422 : vector<2x96xf32>
    %424 = math.exp %423 : vector<2x96xf32>
    %cst_75 = arith.constant 1.000000e+00 : f32
    %425 = vector.broadcast %cst_75 : f32 to vector<2x96xf32>
    %426 = arith.addf %425, %424 : vector<2x96xf32>
    %427 = arith.divf %425, %426 : vector<2x96xf32>
    %428 = vector.extract_strided_slice %421 {offsets = [0, 96], sizes = [2, 32], strides = [1, 1]} : vector<2x128xf32> to vector<2x32xf32>
    %429 = math.tanh %428 : vector<2x32xf32>
    %430 = vector.extract_strided_slice %427 {offsets = [0, 32], sizes = [2, 32], strides = [1, 1]} : vector<2x96xf32> to vector<2x32xf32>
    %431 = arith.mulf %430, %414 : vector<2x32xf32>
    %432 = vector.extract_strided_slice %427 {offsets = [0, 0], sizes = [2, 32], strides = [1, 1]} : vector<2x96xf32> to vector<2x32xf32>
    %433 = arith.mulf %432, %429 : vector<2x32xf32>
    %434 = arith.addf %431, %433 : vector<2x32xf32>
    %435 = vector.extract_strided_slice %427 {offsets = [0, 64], sizes = [2, 32], strides = [1, 1]} : vector<2x96xf32> to vector<2x32xf32>
    %436 = math.tanh %434 : vector<2x32xf32>
    %437 = arith.mulf %435, %436 : vector<2x32xf32>
    %438 = vector.extract_strided_slice %355 {offsets = [8, 0], sizes = [2, 128], strides = [1, 1]} : vector<16x128xf32> to vector<2x128xf32>
    %439 = arith.truncf %437 : vector<2x32xf32> to vector<2x32xbf16>
    %cst_76 = arith.constant dense<0.000000e+00> : vector<2x128xf32>
    %440 = tpu.matmul %439, %350, %cst_76 {dimension_numbers = #tpu.dot_dimension_numbers<[1], [0], [0], [1], [0, 0, 1, 1], [], []>} : vector<2x32xbf16>, vector<32x128xbf16>, vector<2x128xf32> -> vector<2x128xf32>
    %441 = arith.addf %438, %440 : vector<2x128xf32>
    %442 = vector.extract_strided_slice %441 {offsets = [0, 0], sizes = [2, 96], strides = [1, 1]} : vector<2x128xf32> to vector<2x96xf32>
    %443 = arith.negf %442 : vector<2x96xf32>
    %444 = math.exp %443 : vector<2x96xf32>
    %cst_77 = arith.constant 1.000000e+00 : f32
    %445 = vector.broadcast %cst_77 : f32 to vector<2x96xf32>
    %446 = arith.addf %445, %444 : vector<2x96xf32>
    %447 = arith.divf %445, %446 : vector<2x96xf32>
    %448 = vector.extract_strided_slice %441 {offsets = [0, 96], sizes = [2, 32], strides = [1, 1]} : vector<2x128xf32> to vector<2x32xf32>
    %449 = math.tanh %448 : vector<2x32xf32>
    %450 = vector.extract_strided_slice %447 {offsets = [0, 32], sizes = [2, 32], strides = [1, 1]} : vector<2x96xf32> to vector<2x32xf32>
    %451 = arith.mulf %450, %434 : vector<2x32xf32>
    %452 = vector.extract_strided_slice %447 {offsets = [0, 0], sizes = [2, 32], strides = [1, 1]} : vector<2x96xf32> to vector<2x32xf32>
    %453 = arith.mulf %452, %449 : vector<2x32xf32>
    %454 = arith.addf %451, %453 : vector<2x32xf32>
    %455 = vector.extract_strided_slice %447 {offsets = [0, 64], sizes = [2, 32], strides = [1, 1]} : vector<2x96xf32> to vector<2x32xf32>
    %456 = math.tanh %454 : vector<2x32xf32>
    %457 = arith.mulf %455, %456 : vector<2x32xf32>
    %458 = vector.extract_strided_slice %355 {offsets = [10, 0], sizes = [2, 128], strides = [1, 1]} : vector<16x128xf32> to vector<2x128xf32>
    %459 = arith.truncf %457 : vector<2x32xf32> to vector<2x32xbf16>
    %cst_78 = arith.constant dense<0.000000e+00> : vector<2x128xf32>
    %460 = tpu.matmul %459, %350, %cst_78 {dimension_numbers = #tpu.dot_dimension_numbers<[1], [0], [0], [1], [0, 0, 1, 1], [], []>} : vector<2x32xbf16>, vector<32x128xbf16>, vector<2x128xf32> -> vector<2x128xf32>
    %461 = arith.addf %458, %460 : vector<2x128xf32>
    %462 = vector.extract_strided_slice %461 {offsets = [0, 0], sizes = [2, 96], strides = [1, 1]} : vector<2x128xf32> to vector<2x96xf32>
    %463 = arith.negf %462 : vector<2x96xf32>
    %464 = math.exp %463 : vector<2x96xf32>
    %cst_79 = arith.constant 1.000000e+00 : f32
    %465 = vector.broadcast %cst_79 : f32 to vector<2x96xf32>
    %466 = arith.addf %465, %464 : vector<2x96xf32>
    %467 = arith.divf %465, %466 : vector<2x96xf32>
    %468 = vector.extract_strided_slice %461 {offsets = [0, 96], sizes = [2, 32], strides = [1, 1]} : vector<2x128xf32> to vector<2x32xf32>
    %469 = math.tanh %468 : vector<2x32xf32>
    %470 = vector.extract_strided_slice %467 {offsets = [0, 32], sizes = [2, 32], strides = [1, 1]} : vector<2x96xf32> to vector<2x32xf32>
    %471 = arith.mulf %470, %454 : vector<2x32xf32>
    %472 = vector.extract_strided_slice %467 {offsets = [0, 0], sizes = [2, 32], strides = [1, 1]} : vector<2x96xf32> to vector<2x32xf32>
    %473 = arith.mulf %472, %469 : vector<2x32xf32>
    %474 = arith.addf %471, %473 : vector<2x32xf32>
    %475 = vector.extract_strided_slice %467 {offsets = [0, 64], sizes = [2, 32], strides = [1, 1]} : vector<2x96xf32> to vector<2x32xf32>
    %476 = math.tanh %474 : vector<2x32xf32>
    %477 = arith.mulf %475, %476 : vector<2x32xf32>
    %478 = vector.extract_strided_slice %355 {offsets = [12, 0], sizes = [2, 128], strides = [1, 1]} : vector<16x128xf32> to vector<2x128xf32>
    %479 = arith.truncf %477 : vector<2x32xf32> to vector<2x32xbf16>
    %cst_80 = arith.constant dense<0.000000e+00> : vector<2x128xf32>
    %480 = tpu.matmul %479, %350, %cst_80 {dimension_numbers = #tpu.dot_dimension_numbers<[1], [0], [0], [1], [0, 0, 1, 1], [], []>} : vector<2x32xbf16>, vector<32x128xbf16>, vector<2x128xf32> -> vector<2x128xf32>
    %481 = arith.addf %478, %480 : vector<2x128xf32>
    %482 = vector.extract_strided_slice %481 {offsets = [0, 0], sizes = [2, 96], strides = [1, 1]} : vector<2x128xf32> to vector<2x96xf32>
    %483 = arith.negf %482 : vector<2x96xf32>
    %484 = math.exp %483 : vector<2x96xf32>
    %cst_81 = arith.constant 1.000000e+00 : f32
    %485 = vector.broadcast %cst_81 : f32 to vector<2x96xf32>
    %486 = arith.addf %485, %484 : vector<2x96xf32>
    %487 = arith.divf %485, %486 : vector<2x96xf32>
    %488 = vector.extract_strided_slice %481 {offsets = [0, 96], sizes = [2, 32], strides = [1, 1]} : vector<2x128xf32> to vector<2x32xf32>
    %489 = math.tanh %488 : vector<2x32xf32>
    %490 = vector.extract_strided_slice %487 {offsets = [0, 32], sizes = [2, 32], strides = [1, 1]} : vector<2x96xf32> to vector<2x32xf32>
    %491 = arith.mulf %490, %474 : vector<2x32xf32>
    %492 = vector.extract_strided_slice %487 {offsets = [0, 0], sizes = [2, 32], strides = [1, 1]} : vector<2x96xf32> to vector<2x32xf32>
    %493 = arith.mulf %492, %489 : vector<2x32xf32>
    %494 = arith.addf %491, %493 : vector<2x32xf32>
    %495 = vector.extract_strided_slice %487 {offsets = [0, 64], sizes = [2, 32], strides = [1, 1]} : vector<2x96xf32> to vector<2x32xf32>
    %496 = math.tanh %494 : vector<2x32xf32>
    %497 = arith.mulf %495, %496 : vector<2x32xf32>
    %498 = vector.extract_strided_slice %355 {offsets = [14, 0], sizes = [2, 128], strides = [1, 1]} : vector<16x128xf32> to vector<2x128xf32>
    %499 = arith.truncf %497 : vector<2x32xf32> to vector<2x32xbf16>
    %cst_82 = arith.constant dense<0.000000e+00> : vector<2x128xf32>
    %500 = tpu.matmul %499, %350, %cst_82 {dimension_numbers = #tpu.dot_dimension_numbers<[1], [0], [0], [1], [0, 0, 1, 1], [], []>} : vector<2x32xbf16>, vector<32x128xbf16>, vector<2x128xf32> -> vector<2x128xf32>
    %501 = arith.addf %498, %500 : vector<2x128xf32>
    %502 = vector.extract_strided_slice %501 {offsets = [0, 0], sizes = [2, 96], strides = [1, 1]} : vector<2x128xf32> to vector<2x96xf32>
    %503 = arith.negf %502 : vector<2x96xf32>
    %504 = math.exp %503 : vector<2x96xf32>
    %cst_83 = arith.constant 1.000000e+00 : f32
    %505 = vector.broadcast %cst_83 : f32 to vector<2x96xf32>
    %506 = arith.addf %505, %504 : vector<2x96xf32>
    %507 = arith.divf %505, %506 : vector<2x96xf32>
    %508 = vector.extract_strided_slice %501 {offsets = [0, 96], sizes = [2, 32], strides = [1, 1]} : vector<2x128xf32> to vector<2x32xf32>
    %509 = math.tanh %508 : vector<2x32xf32>
    %510 = vector.extract_strided_slice %507 {offsets = [0, 32], sizes = [2, 32], strides = [1, 1]} : vector<2x96xf32> to vector<2x32xf32>
    %511 = arith.mulf %510, %494 : vector<2x32xf32>
    %512 = vector.extract_strided_slice %507 {offsets = [0, 0], sizes = [2, 32], strides = [1, 1]} : vector<2x96xf32> to vector<2x32xf32>
    %513 = arith.mulf %512, %509 : vector<2x32xf32>
    %514 = arith.addf %511, %513 : vector<2x32xf32>
    %515 = vector.extract_strided_slice %507 {offsets = [0, 64], sizes = [2, 32], strides = [1, 1]} : vector<2x96xf32> to vector<2x32xf32>
    %516 = math.tanh %514 : vector<2x32xf32>
    %517 = arith.mulf %515, %516 : vector<2x32xf32>
    %c0_84 = arith.constant 0 : index
    %c0_85 = arith.constant 0 : index
    %518 = vector.load %arg2[%c0_84, %c0_85] : memref<2x1xf32, #tpu.memory_space<vmem>>, vector<2x1xf32>
    %c0_86 = arith.constant 0 : index
    %c0_87 = arith.constant 0 : index
    %519 = vector.load %arg7[%c0_86, %c0_87] : memref<8x64xf32, #tpu.memory_space<vmem>>, vector<1x64xf32>
    %520 = vector.broadcast %519 : vector<1x64xf32> to vector<2x64xf32>
    %521 = arith.mulf %169, %520 : vector<2x64xf32>
    %c1_88 = arith.constant 1 : index
    %c0_89 = arith.constant 0 : index
    %522 = vector.load %arg7[%c1_88, %c0_89] : memref<8x64xf32, #tpu.memory_space<vmem>>, vector<1x64xf32>
    %523 = vector.broadcast %522 : vector<1x64xf32> to vector<2x64xf32>
    %524 = arith.addf %521, %523 : vector<2x64xf32>
    %cst_90 = arith.constant 0.000000e+00 : f32
    %525 = vector.broadcast %cst_90 : f32 to vector<2x64xf32>
    %526 = arith.maximumf %524, %525 : vector<2x64xf32>
    %c2_91 = arith.constant 2 : index
    %c0_92 = arith.constant 0 : index
    %527 = vector.load %arg7[%c2_91, %c0_92] : memref<8x64xf32, #tpu.memory_space<vmem>>, vector<1x32xf32>
    %528 = vector.broadcast %527 : vector<1x32xf32> to vector<2x32xf32>
    %529 = arith.mulf %517, %528 : vector<2x32xf32>
    %c3 = arith.constant 3 : index
    %c0_93 = arith.constant 0 : index
    %530 = vector.load %arg7[%c3, %c0_93] : memref<8x64xf32, #tpu.memory_space<vmem>>, vector<1x32xf32>
    %531 = vector.broadcast %530 : vector<1x32xf32> to vector<2x32xf32>
    %532 = arith.addf %529, %531 : vector<2x32xf32>
    %cst_94 = arith.constant 0.000000e+00 : f32
    %533 = vector.broadcast %cst_94 : f32 to vector<2x32xf32>
    %534 = arith.maximumf %532, %533 : vector<2x32xf32>
    %c4_95 = arith.constant 4 : index
    %c0_96 = arith.constant 0 : index
    %535 = vector.load %arg7[%c4_95, %c0_96] : memref<8x64xf32, #tpu.memory_space<vmem>>, vector<1x1xf32>
    %536 = vector.broadcast %535 : vector<1x1xf32> to vector<2x1xf32>
    %537 = arith.mulf %518, %536 : vector<2x1xf32>
    %c5 = arith.constant 5 : index
    %c0_97 = arith.constant 0 : index
    %538 = vector.load %arg7[%c5, %c0_97] : memref<8x64xf32, #tpu.memory_space<vmem>>, vector<1x1xf32>
    %539 = vector.broadcast %538 : vector<1x1xf32> to vector<2x1xf32>
    %540 = arith.addf %537, %539 : vector<2x1xf32>
    %cst_98 = arith.constant 0.000000e+00 : f32
    %541 = vector.broadcast %cst_98 : f32 to vector<2x1xf32>
    %542 = arith.maximumf %540, %541 : vector<2x1xf32>
    %c0_99 = arith.constant 0 : index
    %c0_100 = arith.constant 0 : index
    %543 = vector.load %arg8[%c0_99, %c0_100] : memref<104x16xf32, #tpu.memory_space<vmem>>, vector<64x16xf32>
    %cst_101 = arith.constant dense<0.000000e+00> : vector<2x16xf32>
    %544 = tpu.matmul %526, %543, %cst_101 {dimension_numbers = #tpu.dot_dimension_numbers<[1], [0], [0], [1], [0, 0, 1, 1], [], []>} : vector<2x64xf32>, vector<64x16xf32>, vector<2x16xf32> -> vector<2x16xf32>
    %c64 = arith.constant 64 : index
    %c0_102 = arith.constant 0 : index
    %545 = vector.load %arg8[%c64, %c0_102] : memref<104x16xf32, #tpu.memory_space<vmem>>, vector<32x16xf32>
    %cst_103 = arith.constant dense<0.000000e+00> : vector<2x16xf32>
    %546 = tpu.matmul %534, %545, %cst_103 {dimension_numbers = #tpu.dot_dimension_numbers<[1], [0], [0], [1], [0, 0, 1, 1], [], []>} : vector<2x32xf32>, vector<32x16xf32>, vector<2x16xf32> -> vector<2x16xf32>
    %547 = arith.addf %544, %546 : vector<2x16xf32>
    %c96 = arith.constant 96 : index
    %c0_104 = arith.constant 0 : index
    %548 = vector.load %arg8[%c96, %c0_104] : memref<104x16xf32, #tpu.memory_space<vmem>>, vector<1x16xf32>
    %549 = vector.broadcast %542 : vector<2x1xf32> to vector<2x16xf32>
    %550 = vector.broadcast %548 : vector<1x16xf32> to vector<2x16xf32>
    %551 = arith.mulf %549, %550 : vector<2x16xf32>
    %552 = arith.addf %547, %551 : vector<2x16xf32>
    %c97 = arith.constant 97 : index
    %c0_105 = arith.constant 0 : index
    %553 = vector.load %arg8[%c97, %c0_105] : memref<104x16xf32, #tpu.memory_space<vmem>>, vector<1x16xf32>
    %554 = vector.broadcast %553 : vector<1x16xf32> to vector<2x16xf32>
    %555 = arith.addf %552, %554 : vector<2x16xf32>
    %c98 = arith.constant 98 : index
    %c0_106 = arith.constant 0 : index
    %556 = vector.load %arg8[%c98, %c0_106] : memref<104x16xf32, #tpu.memory_space<vmem>>, vector<1x16xf32>
    %557 = vector.broadcast %556 : vector<1x16xf32> to vector<2x16xf32>
    %558 = arith.mulf %555, %557 : vector<2x16xf32>
    %c99 = arith.constant 99 : index
    %c0_107 = arith.constant 0 : index
    %559 = vector.load %arg8[%c99, %c0_107] : memref<104x16xf32, #tpu.memory_space<vmem>>, vector<1x16xf32>
    %560 = vector.broadcast %559 : vector<1x16xf32> to vector<2x16xf32>
    %561 = arith.addf %558, %560 : vector<2x16xf32>
    %cst_108 = arith.constant 0.000000e+00 : f32
    %562 = vector.broadcast %cst_108 : f32 to vector<2x16xf32>
    %563 = arith.maximumf %561, %562 : vector<2x16xf32>
    %c100 = arith.constant 100 : index
    %c0_109 = arith.constant 0 : index
    %564 = vector.load %arg8[%c100, %c0_109] : memref<104x16xf32, #tpu.memory_space<vmem>>, vector<1x16xf32>
    %565 = vector.broadcast %564 : vector<1x16xf32> to vector<2x16xf32>
    %566 = arith.mulf %563, %565 : vector<2x16xf32>
    %cst_110 = arith.constant dense<0.000000e+00> : vector<2xf32>
    %567 = vector.multi_reduction <add>, %566, %cst_110 [1] : vector<2x16xf32> to vector<2xf32>
    %568 = vector.shape_cast %567 : vector<2xf32> to vector<2x1xf32>
    %c101 = arith.constant 101 : index
    %c0_111 = arith.constant 0 : index
    %569 = vector.load %arg8[%c101, %c0_111] : memref<104x16xf32, #tpu.memory_space<vmem>>, vector<1x1xf32>
    %570 = vector.broadcast %569 : vector<1x1xf32> to vector<2x1xf32>
    %571 = arith.addf %568, %570 : vector<2x1xf32>
    %c0_112 = arith.constant 0 : index
    %c0_113 = arith.constant 0 : index
    %572 = vector.load %arg9[%c0_112, %c0_113] : memref<2x1xf32, #tpu.memory_space<vmem>>, vector<2x1xf32>
    tpu.vector_store %arg9[%c0_112, %c0_113], %571 {strides = array<i32>} : memref<2x1xf32, #tpu.memory_space<vmem>>, vector<2x1xf32>,
    return
  }
}

</mosaic_0001>

<bundles_post_ra>
// kernel: forward.1
= control target key start
LH: loop header
LB: loop body
LE: loop exit
PB: predicated region body
PF: predicated region fallthrough
CT: control target
= control target key end

     0   :  { %vm66_vm0 = vcmask 1041408   ;;  %v3110_v1 = vmov 0   ;;  %vm62_vm1 = vcmask 31744   ;;  %v47_v16 = vlaneseq  ;;  %s3114_s20 = smov 32   ;;  %s3755_s3 = inlined_call_operand.vmem [shape: bf16[80,256], index: 3, kind: input, shape index: {}]   ;;  %s3756_s0 = inlined_call_operand.vmem [shape: f32[16,4], index: 0, kind: input, shape index: {}]   ;;  %s3757_s4 = inlined_call_operand.vmem [shape: f32[1,256], index: 4, kind: input, shape index: {}]   ;;  %s3758_s5 = inlined_call_operand.vmem [shape: bf16[112,128], index: 5, kind: input, shape index: {}]   ;;  %s3759_s1 = inlined_call_operand.vmem [shape: f32[16,4], index: 1, kind: input, shape index: {}]   ;;  %s3760_s6 = inlined_call_operand.vmem [shape: f32[2,128], index: 6, kind: input, shape index: {}]   ;;  %s3761_s7 = inlined_call_operand.vmem [shape: f32[8,64], index: 7, kind: input, shape index: {}]   ;;  %s3762_s8 = inlined_call_operand.vmem [shape: f32[104,16], index: 8, kind: input, shape index: {}]   ;;  %s3763_s2 = inlined_call_operand.vmem [shape: f32[2,1], index: 2, kind: input, shape index: {}]   ;;  %s3764_s9 = inlined_call_operand.vmem [shape: f32[2,1], index: 9, kind: output, shape index: {}]  }
   0x1   :  { %v35_v0 = vld [vmem:[%s3755_s3] sm:$0x33]  ;;  %105 = vmatprep.mubr.bf16.mxu1 %v3110_v1  ;;  %v34_v3 = vld [vmem:[%s3756_s0 + $0x8] sm:$0xff]  ;;  %269 = vmatprep.mubr.bf16.mxu0 %v3110_v1  ;;  %v3193_v10 = vld [vmem:[%s3755_s3 + $0x34] ss:$8 sps:$4 sm:$0xff]   ;;  %vm156_vm2 = vcmask 523264  }
   0x2   :  { %v33_v2 = vld [vmem:[%s3756_s0] sm:$0xff]  ;;  %v2532_v4 = vcombine.high %v35_v0, %v35_v0  ;;  %v2531_v5 = vcombine.low %v35_v0, %v35_v0  ;;  %2864 = vset.pattern.permute.xlu1 %v3110_v1  ;;  %2865 = vset.pattern.permute.xlu0 %v3110_v1  ;;  %v3203_v11 = vld [vmem:[%s3755_s3 + $0x30] ss:$8 sps:$4 sm:$0xff]   ;;  %v3224_v14 = vld [vmem:[%s3755_s3 + $0x14] ss:$8 sps:$4 sm:$0xff]   ;;  %v48_v17 = vshrl.u32 %v47_v16, 7 }
   0x3   :  { %v3179_v6 = vld [vmem:[%s3755_s3 + $0x44] ss:$8 sps:$4 sm:$0xff]   ;;  %v3186_v7 = vld [vmem:[%s3755_s3 + $0x40] ss:$8 sps:$4 sm:$0xff]   ;;  %v45_v9 = vpack.c.bf16 %v34_v3, %v33_v2  ;;  %v3232_v15 = vld [vmem:[%s3755_s3 + $0x10] ss:$8 sps:$4 sm:$0xff]  }
   0x4   :  { %2533 = vmatprep.subr.msk.bf16.mxu1 %vm66_vm0, %v2532_v4  ;;  %v68_v8 = vsel %vm66_vm0, %v2531_v5, 0  ;;  %245 = vmatprep.subr.bf16.mxu0 %v3179_v6  ;;  %v3209_v12 = vld [vmem:[%s3755_s3 + $0x24] ss:$8 sps:$4 sm:$0xff]   ;;  %v3218_v13 = vld [vmem:[%s3755_s3 + $0x20] ss:$8 sps:$4 sm:$0xff]   ;;  %v49_v18 = vsub.s32 0, %v48_v17 }
   0x5   :  { %88 = vmatpush1.bf16.msra.mxu1 %v68_v8  ;;  %246 = vmatpush1.bf16.msra.mxu0 %v3186_v7  ;;  %v44_v19 = vld [vmem:[%s3757_s4] sm:$0x3]  ;;  %v53_v21 = vsub.s32 1, %v48_v17  ;;  %s3111_s4 = smov 64   ;;  %vm3113_vm3 = vmmov 0   ;;  %vm911_vm4 = vcmask 261120  }
   0x6   :  { %168 = vmatprep.subr.bf16.mxu1 %v3179_v6  ;;  %247 = vmatprep.subr.bf16.mxu0 %v3193_v10  ;;  %v50_v23 = vrot.slane %v44_v19, %v49_v18  ;;  %vm983_vm5 = vcmask 254976   ;;  %vm1152_vm6 = vcmask 259076   ;;  %vm1067_vm7 = vcmask 257026  }
   0x7   :  { %v54_v25 = vrot.slane %v44_v19, %v53_v21  ;;  %vm1237_vm8 = vcmask 261126   ;;  %vm2515_vm9 = vcmask 123904   ;;  %vm2525_vm10 = vcmask 1024  }
   0x8   :  { %2534 = vmatmul.mubr.msk.bf16.vlgmr.msra.gmra.mxu1 %vm62_vm1, %v45_v9 }
   0x9   :  { %169 = vmatpush1.bf16.msra.mxu1 %v3186_v7  ;;  %192 = vmatprep.mubr.bf16.mxu1 %v3110_v1 }
   0xa   :  { %170 = vmatprep.subr.bf16.mxu1 %v3193_v10  ;;  %248 = vmatpush1.bf16.msra.mxu0 %v3203_v11 }
   0xb   :  { %249 = vmatprep.subr.bf16.mxu0 %v3209_v12 }
   0xd   :  { %171 = vmatpush1.bf16.msra.mxu1 %v3203_v11 }
   0xe   :  { %172 = vmatprep.subr.bf16.mxu1 %v3209_v12  ;;  %250 = vmatpush1.bf16.msra.mxu0 %v3218_v13 }
   0xf   :  { %251 = vmatprep.subr.bf16.mxu0 %v3224_v14 }
  0x11   :  { %173 = vmatpush1.bf16.msra.mxu1 %v3218_v13 }
  0x12   :  { %174 = vmatprep.subr.bf16.mxu1 %v3224_v14  ;;  %252 = vmatpush1.bf16.msra.mxu0 %v3232_v15 }
  0x13   :  { %421 = vmatprep.subr.bf16.mxu0 %v3179_v6 }
  0x15   :  { %175 = vmatpush1.bf16.msra.mxu1 %v3232_v15 }
  0x16   :  { %333 = vmatprep.subr.bf16.mxu1 %v3179_v6 }
  0x18   :  { %193 = vmatmul.mubr.bf16.vlgmr.msra.gmra.mxu1 %v3110_v1 }
  0x19   :  { %334 = vmatpush1.bf16.msra.mxu1 %v3186_v7  ;;  %357 = vmatprep.mubr.bf16.mxu1 %v3110_v1 }
  0x1a   :  { %335 = vmatprep.subr.bf16.mxu1 %v3193_v10 }
  0x1d   :  { %336 = vmatpush1.bf16.msra.mxu1 %v3203_v11 }
  0x1e   :  { %337 = vmatprep.subr.bf16.mxu1 %v3209_v12 }
  0x21   :  { %338 = vmatpush1.bf16.msra.mxu1 %v3218_v13 }
  0x22   :  { %339 = vmatprep.subr.bf16.mxu1 %v3224_v14 }
  0x25   :  { %340 = vmatpush1.bf16.msra.mxu1 %v3232_v15 }
  0x26   :  { %509 = vmatprep.subr.bf16.mxu1 %v3179_v6 }
  0xc8   :  { %v107_v20 = vpop.f32.mrf.mxu1 }
  0xc9   :  { %v3261_v36 = vadd.f32 %v107_v20, %v50_v23 }
  0xca   :  { %v109_v22 = vpop.f32.mrf.mxu1 }
  0xcb   :  { %v3257_v30 = vadd.f32 %v109_v22, %v54_v25 }
  0xcc   :  { %v111_v24 = vpop.f32.mrf.mxu1 }
  0xcd   :  { %v3253_v26 = vadd.f32 %v111_v24, %v50_v23 }
  0xce   :  { %v113_v27 = vpop.f32.mrf.mxu1 }
  0xcf   :  { %v3255_v28 = vadd.f32 %v113_v27, %v54_v25 }
  0xd8   :  { %v194_v29 = vpop.f32.mrf.mxu1 }
  0xd9   :  { %v201_v37 = vadd.f32 %v194_v29, %v3261_v36 }
  0xda   :  { %v196_v31 = vpop.f32.mrf.mxu1 }
  0xdb   :  { %v202_v32 = vadd.f32 %v196_v31, %v3257_v30  ;;  %v2543_v38 = vmul.f32 -1.442695, %v201_v37 }
  0xdc   :  { %v198_v33 = vpop.f32.mrf.mxu1 }
  0xdd   :  { %2886 = vtanh.f32 %v202_v32  ;;  %v2544_v48 = vmul.f32 -1.442695, %v202_v32 }
  0xde   :  { %v199_v34 = vpop.f32.mrf.mxu1  ;;  %2888 = vpow2.f32 %v2543_v38 }
  0xea   :  { %v2887_v35 = vpop.eup %2886 }
  0xeb   :  { %218 = vrot.lane.b32.xlu0 %v2887_v35, %s3111_s4  ;;  %v2889_v39 = vpop.eup %2888 }
  0xec   :  { %v209_v40 = vadd.f32 1.0, %v2889_v39 }
  0xee   :  { %2890 = vrcp.f32 %v209_v40 }
  0xfb   :  { %v2891_v41 = vpop.eup %2890 }
  0xfc   :  { %v216_v44 = vmul.f32 0.0, %v2891_v41 }
 0x15d   :  { %v219_v42 = vpop.permute.xlu0 %218 }
 0x15e   :  { %v221_v43 = vmul.f32 %v2891_v41, %v219_v42 }
 0x160   :  { %223 = vrot.lane.b32.xlu0 %v221_v43, %s3111_s4 }
 0x1d2   :  { %v224_v45 = vpop.permute.xlu0 %223 }
 0x1d3   :  { %v226_v46 = vadd.f32 %v224_v45, %v216_v44 }
 0x1d5   :  { %2892 = vtanh.f32 %v226_v46  ;;  %v300_v9 = vrot.slane %v226_v46, 6 }
 0x1d6   :  { %2894 = vpow2.f32 %v2544_v48 }
 0x1e2   :  { %v2893_v47 = vpop.eup %2892 }
 0x1e3   :  { %229 = vrot.lane.b32.xlu1 %v2893_v47, %s3111_s4  ;;  %v2895_v49 = vpop.eup %2894 }
 0x1e4   :  { %v210_v50 = vadd.f32 1.0, %v2895_v49 }
 0x1e6   :  { %2896 = vrcp.f32 %v210_v50 }
 0x1f3   :  { %v2897_v51 = vpop.eup %2896 }
 0x255   :  { %v230_v52 = vpop.permute.xlu1 %229 }
 0x256   :  { %v232_v53 = vmul.f32 %v2897_v51, %v230_v52 }
 0x258   :  { %v233_v54 = vpack.c.bf16 %v232_v53, %v232_v53 }
 0x25a   :  { %2545 = vmatmul.mubr.msk.bf16.vlgmr.msra.gmra.mxu0 %vm156_vm2, %v233_v54 }
 0x25b   :  { %422 = vmatpush1.bf16.msra.mxu0 %v3186_v7  ;;  %445 = vmatprep.mubr.bf16.mxu0 %v3110_v1 }
 0x25c   :  { %423 = vmatprep.subr.bf16.mxu0 %v3193_v10 }
 0x25f   :  { %424 = vmatpush1.bf16.msra.mxu0 %v3203_v11 }
 0x260   :  { %425 = vmatprep.subr.bf16.mxu0 %v3209_v12 }
 0x263   :  { %426 = vmatpush1.bf16.msra.mxu0 %v3218_v13 }
 0x264   :  { %427 = vmatprep.subr.bf16.mxu0 %v3224_v14 }
 0x267   :  { %428 = vmatpush1.bf16.msra.mxu0 %v3232_v15 }
 0x268   :  { %589 = vmatprep.subr.bf16.mxu0 %v3179_v6 }
 0x31a   :  { %v271_v55 = vpop.f32.mrf.mxu0 }
 0x31b   :  { %v280_v62 = vrot.slane %v271_v55, 6 }
 0x31c   :  { %v273_v56 = vpop.f32.mrf.mxu0 }
 0x31d   :  { %v281_v57 = vrot.slane %v273_v56, 6  ;;  %v284_v63 = vadd.f32 %v280_v62, %v3261_v36 }
 0x31e   :  { %v275_v58 = vpop.f32.mrf.mxu0 }
 0x31f   :  { %v285_v59 = vadd.f32 %v281_v57, %v3257_v30  ;;  %v2546_v0 = vmul.f32 -1.442695, %v284_v63 }
 0x320   :  { %v276_v60 = vpop.f32.mrf.mxu0 }
 0x321   :  { %2898 = vtanh.f32 %v285_v59  ;;  %v2547_v20 = vmul.f32 -1.442695, %v285_v59 }
 0x322   :  { %2900 = vpow2.f32 %v2546_v0 }
 0x32e   :  { %v2899_v61 = vpop.eup %2898 }
 0x32f   :  { %304 = vrot.lane.b32.xlu1 %v2899_v61, %s3111_s4  ;;  %v2901_v2 = vpop.eup %2900 }
 0x330   :  { %v292_v3 = vadd.f32 1.0, %v2901_v2 }
 0x332   :  { %2902 = vrcp.f32 %v292_v3 }
 0x33f   :  { %v2903_v4 = vpop.eup %2902 }
 0x340   :  { %v302_v16 = vmul.f32 %v2903_v4, %v300_v9 }
 0x3a1   :  { %v305_v5 = vpop.permute.xlu1 %304 }
 0x3a2   :  { %v307_v8 = vmul.f32 %v2903_v4, %v305_v5 }
 0x3a4   :  { %309 = vrot.lane.b32.xlu0 %v307_v8, %s3111_s4 }
 0x416   :  { %v310_v17 = vpop.permute.xlu0 %309 }
 0x417   :  { %v312_v18 = vadd.f32 %v310_v17, %v302_v16 }
 0x419   :  { %2904 = vtanh.f32 %v312_v18  ;;  %v388_v47 = vrot.slane %v312_v18, 6 }
 0x41a   :  { %2906 = vpow2.f32 %v2547_v20 }
 0x426   :  { %v2905_v19 = vpop.eup %2904 }
 0x427   :  { %315 = vrot.lane.b32.xlu1 %v2905_v19, %s3111_s4  ;;  %v2907_v21 = vpop.eup %2906 }
 0x428   :  { %v293_v22 = vadd.f32 1.0, %v2907_v21 }
 0x42a   :  { %2908 = vrcp.f32 %v293_v22 }
 0x437   :  { %v2909_v23 = vpop.eup %2908 }
 0x499   :  { %v316_v24 = vpop.permute.xlu1 %315 }
 0x49a   :  { %v318_v25 = vmul.f32 %v2909_v23, %v316_v24 }
 0x49c   :  { %v319_v27 = vpack.c.bf16 %v318_v25, %v318_v25 }
 0x49e   :  { %v321_v29 = vrot.slane %v319_v27, 1 }
 0x4a0   :  { %2548 = vmatmul.mubr.msk.bf16.vlgmr.msra.gmra.mxu1 %vm156_vm2, %v321_v29 }
 0x4a1   :  { %510 = vmatpush1.bf16.msra.mxu1 %v3186_v7  ;;  %533 = vmatprep.mubr.bf16.mxu1 %v3110_v1 }
 0x4a2   :  { %511 = vmatprep.subr.bf16.mxu1 %v3193_v10 }
 0x4a5   :  { %512 = vmatpush1.bf16.msra.mxu1 %v3203_v11 }
 0x4a6   :  { %513 = vmatprep.subr.bf16.mxu1 %v3209_v12 }
 0x4a9   :  { %514 = vmatpush1.bf16.msra.mxu1 %v3218_v13 }
 0x4aa   :  { %515 = vmatprep.subr.bf16.mxu1 %v3224_v14 }
 0x4ad   :  { %516 = vmatpush1.bf16.msra.mxu1 %v3232_v15 }
 0x4ae   :  { %677 = vmatprep.subr.bf16.mxu1 %v3179_v6 }
 0x560   :  { %v359_v31 = vpop.f32.mrf.mxu1 }
 0x561   :  { %v368_v39 = vrot.slane %v359_v31, 4 }
 0x562   :  { %v361_v32 = vpop.f32.mrf.mxu1 }
 0x563   :  { %v369_v33 = vrot.slane %v361_v32, 4  ;;  %v372_v40 = vadd.f32 %v368_v39, %v3261_v36 }
 0x564   :  { %v363_v34 = vpop.f32.mrf.mxu1 }
 0x565   :  { %v373_v35 = vadd.f32 %v369_v33, %v3257_v30  ;;  %v2549_v41 = vmul.f32 -1.442695, %v372_v40 }
 0x566   :  { %v364_v37 = vpop.f32.mrf.mxu1 }
 0x567   :  { %2910 = vtanh.f32 %v373_v35  ;;  %v2550_v52 = vmul.f32 -1.442695, %v373_v35 }
 0x568   :  { %2912 = vpow2.f32 %v2549_v41 }
 0x574   :  { %v2911_v38 = vpop.eup %2910 }
 0x575   :  { %392 = vrot.lane.b32.xlu0 %v2911_v38, %s3111_s4  ;;  %v2913_v42 = vpop.eup %2912 }
 0x576   :  { %v380_v43 = vadd.f32 1.0, %v2913_v42 }
 0x578   :  { %2914 = vrcp.f32 %v380_v43 }
 0x585   :  { %v2915_v44 = vpop.eup %2914 }
 0x586   :  { %v390_v48 = vmul.f32 %v2915_v44, %v388_v47 }
 0x5e7   :  { %v393_v45 = vpop.permute.xlu0 %392 }
 0x5e8   :  { %v395_v46 = vmul.f32 %v2915_v44, %v393_v45 }
 0x5ea   :  { %397 = vrot.lane.b32.xlu1 %v395_v46, %s3111_s4 }
 0x65c   :  { %v398_v49 = vpop.permute.xlu1 %397 }
 0x65d   :  { %v400_v50 = vadd.f32 %v398_v49, %v390_v48 }
 0x65f   :  { %2916 = vtanh.f32 %v400_v50  ;;  %v476_v19 = vrot.slane %v400_v50, 6 }
 0x660   :  { %2918 = vpow2.f32 %v2550_v52 }
 0x66c   :  { %v2917_v51 = vpop.eup %2916 }
 0x66d   :  { %403 = vrot.lane.b32.xlu0 %v2917_v51, %s3111_s4  ;;  %v2919_v53 = vpop.eup %2918 }
 0x66e   :  { %v381_v54 = vadd.f32 1.0, %v2919_v53 }
 0x670   :  { %2920 = vrcp.f32 %v381_v54 }
 0x67d   :  { %v2921_v55 = vpop.eup %2920 }
 0x6df   :  { %v404_v56 = vpop.permute.xlu0 %403 }
 0x6e0   :  { %v406_v57 = vmul.f32 %v2921_v55, %v404_v56 }
 0x6e2   :  { %v407_v58 = vpack.c.bf16 %v406_v57, %v406_v57 }
 0x6e4   :  { %v409_v59 = vrot.slane %v407_v58, 2 }
 0x6e6   :  { %2551 = vmatmul.mubr.msk.bf16.vlgmr.msra.gmra.mxu0 %vm156_vm2, %v409_v59 }
 0x6e7   :  { %590 = vmatpush1.bf16.msra.mxu0 %v3186_v7  ;;  %613 = vmatprep.mubr.bf16.mxu0 %v3110_v1 }
 0x6e8   :  { %591 = vmatprep.subr.bf16.mxu0 %v3193_v10 }
 0x6eb   :  { %592 = vmatpush1.bf16.msra.mxu0 %v3203_v11 }
 0x6ec   :  { %593 = vmatprep.subr.bf16.mxu0 %v3209_v12 }
 0x6ef   :  { %594 = vmatpush1.bf16.msra.mxu0 %v3218_v13 }
 0x6f0   :  { %595 = vmatprep.subr.bf16.mxu0 %v3224_v14 }
 0x6f3   :  { %596 = vmatpush1.bf16.msra.mxu0 %v3232_v15 }
 0x6f4   :  { %765 = vmatprep.subr.bf16.mxu0 %v3179_v6 }
 0x7a6   :  { %v447_v60 = vpop.f32.mrf.mxu0 }
 0x7a7   :  { %v456_v4 = vrot.slane %v447_v60, 2 }
 0x7a8   :  { %v449_v61 = vpop.f32.mrf.mxu0 }
 0x7a9   :  { %v457_v62 = vrot.slane %v449_v61, 2  ;;  %v460_v5 = vadd.f32 %v456_v4, %v3261_v36 }
 0x7aa   :  { %v451_v63 = vpop.f32.mrf.mxu0 }
 0x7ab   :  { %v461_v0 = vadd.f32 %v457_v62, %v3257_v30  ;;  %v2552_v8 = vmul.f32 -1.442695, %v460_v5 }
 0x7ac   :  { %v452_v2 = vpop.f32.mrf.mxu0 }
 0x7ad   :  { %2922 = vtanh.f32 %v461_v0  ;;  %v2553_v23 = vmul.f32 -1.442695, %v461_v0 }
 0x7ae   :  { %2924 = vpow2.f32 %v2552_v8 }
 0x7ba   :  { %v2923_v3 = vpop.eup %2922 }
 0x7bb   :  { %480 = vrot.lane.b32.xlu1 %v2923_v3, %s3111_s4  ;;  %v2925_v9 = vpop.eup %2924 }
 0x7bc   :  { %v468_v16 = vadd.f32 1.0, %v2925_v9 }
 0x7be   :  { %2926 = vrcp.f32 %v468_v16 }
 0x7cb   :  { %v2927_v6 = vpop.eup %2926 }
 0x7cc   :  { %v478_v30 = vmul.f32 %v2927_v6, %v476_v19 }
 0x82d   :  { %v481_v17 = vpop.permute.xlu1 %480 }
 0x82e   :  { %v483_v18 = vmul.f32 %v2927_v6, %v481_v17 }
 0x830   :  { %485 = vrot.lane.b32.xlu0 %v483_v18, %s3111_s4 }
 0x8a2   :  { %v486_v20 = vpop.permute.xlu0 %485 }
 0x8a3   :  { %v488_v21 = vadd.f32 %v486_v20, %v478_v30 }
 0x8a5   :  { %2928 = vtanh.f32 %v488_v21  ;;  %v558_v47 = vrot.slane %v488_v21, 6 }
 0x8a6   :  { %2930 = vpow2.f32 %v2553_v23 }
 0x8b2   :  { %v2929_v22 = vpop.eup %2928 }
 0x8b3   :  { %491 = vrot.lane.b32.xlu1 %v2929_v22, %s3111_s4  ;;  %v2931_v36 = vpop.eup %2930 }
 0x8b4   :  { %v469_v24 = vadd.f32 1.0, %v2931_v36 }
 0x8b6   :  { %2932 = vrcp.f32 %v469_v24 }
 0x8c3   :  { %v2933_v25 = vpop.eup %2932 }
 0x925   :  { %v492_v27 = vpop.permute.xlu1 %491 }
 0x926   :  { %v494_v29 = vmul.f32 %v2933_v25, %v492_v27 }
 0x928   :  { %v495_v31 = vpack.c.bf16 %v494_v29, %v494_v29 }
 0x92a   :  { %v497_v32 = vrot.slane %v495_v31, 3 }
 0x92c   :  { %2554 = vmatmul.mubr.msk.bf16.vlgmr.msra.gmra.mxu1 %vm156_vm2, %v497_v32 }
 0x92d   :  { %678 = vmatpush1.bf16.msra.mxu1 %v3186_v7  ;;  %701 = vmatprep.mubr.bf16.mxu1 %v3110_v1 }
 0x92e   :  { %679 = vmatprep.subr.bf16.mxu1 %v3193_v10 }
 0x931   :  { %680 = vmatpush1.bf16.msra.mxu1 %v3203_v11 }
 0x932   :  { %681 = vmatprep.subr.bf16.mxu1 %v3209_v12 }
 0x935   :  { %682 = vmatpush1.bf16.msra.mxu1 %v3218_v13 }
 0x936   :  { %683 = vmatprep.subr.bf16.mxu1 %v3224_v14 }
 0x939   :  { %684 = vmatpush1.bf16.msra.mxu1 %v3232_v15 }
 0x9ec   :  { %v535_v33 = vpop.f32.mrf.mxu1 }
 0x9ed   :  { %v542_v40 = vadd.f32 %v535_v33, %v3253_v26 }
 0x9ee   :  { %v537_v34 = vpop.f32.mrf.mxu1 }
 0x9ef   :  { %v543_v35 = vadd.f32 %v537_v34, %v3255_v28  ;;  %v2555_v41 = vmul.f32 -1.442695, %v542_v40 }
 0x9f0   :  { %v539_v37 = vpop.f32.mrf.mxu1 }
 0x9f1   :  { %2934 = vtanh.f32 %v543_v35  ;;  %v2556_v52 = vmul.f32 -1.442695, %v543_v35 }
 0x9f2   :  { %v540_v38 = vpop.f32.mrf.mxu1  ;;  %2936 = vpow2.f32 %v2555_v41 }
 0x9fe   :  { %v2935_v39 = vpop.eup %2934 }
 0x9ff   :  { %562 = vrot.lane.b32.xlu0 %v2935_v39, %s3111_s4  ;;  %v2937_v42 = vpop.eup %2936 }
 0xa00   :  { %v550_v43 = vadd.f32 1.0, %v2937_v42 }
 0xa02   :  { %2938 = vrcp.f32 %v550_v43 }
 0xa0f   :  { %v2939_v44 = vpop.eup %2938 }
 0xa10   :  { %v560_v48 = vmul.f32 %v2939_v44, %v558_v47 }
 0xa71   :  { %v563_v45 = vpop.permute.xlu0 %562 }
 0xa72   :  { %v565_v46 = vmul.f32 %v2939_v44, %v563_v45  ;;  %v841_v45 = vld [vmem:[%s3758_s5] sm:$0x3] }
 0xa73   :  { %v856_v47 = vsel %vm66_vm0, %v841_v45, 0 }
 0xa74   :  { %567 = vrot.lane.b32.xlu1 %v565_v46, %s3111_s4  ;;  %v3112_v46 = vmov 0.0  }
 0xa75   :  { %2687 = vmatprep.subr.bf16.mxu1 %v3112_v46 }
 0xae6   :  { %v568_v49 = vpop.permute.xlu1 %567 }
 0xae7   :  { %v570_v50 = vadd.f32 %v568_v49, %v560_v48  ;;  %v839_v48 = vld [vmem:[%s3759_s1] sm:$0xff]  ;;  %v840_v49 = vld [vmem:[%s3759_s1 + $0x8] sm:$0xff] }
 0xae9   :  { %2940 = vtanh.f32 %v570_v50  ;;  %v644_v4 = vrot.slane %v570_v50, 6  ;;  %v847_v50 = vpack.c.bf16 %v840_v49, %v839_v48 }
 0xaea   :  { %2942 = vpow2.f32 %v2556_v52  ;;  %v3375_v52 = vld [vmem:[%s3758_s5 + $0x8] sm:$0xff]  }
 0xaf6   :  { %v2941_v51 = vpop.eup %2940 }
 0xaf7   :  { %573 = vrot.lane.b32.xlu0 %v2941_v51, %s3111_s4  ;;  %v2943_v53 = vpop.eup %2942  ;;  %v3365_v51 = vld [vmem:[%s3758_s5 + $0x10] sm:$0xff]  }
 0xaf8   :  { %v551_v54 = vadd.f32 1.0, %v2943_v53 }
 0xafa   :  { %2944 = vrcp.f32 %v551_v54 }
 0xb07   :  { %v2945_v55 = vpop.eup %2944 }
 0xb69   :  { %v574_v56 = vpop.permute.xlu0 %573 }
 0xb6a   :  { %v576_v57 = vmul.f32 %v2945_v55, %v574_v56 }
 0xb6c   :  { %v577_v58 = vpack.c.bf16 %v576_v57, %v576_v57 }
 0xb6e   :  { %2557 = vmatmul.mubr.msk.bf16.vlgmr.msra.gmra.mxu0 %vm156_vm2, %v577_v58 }
 0xb6f   :  { %766 = vmatpush1.bf16.msra.mxu0 %v3186_v7  ;;  %789 = vmatprep.mubr.bf16.mxu0 %v3110_v1 }
 0xb70   :  { %767 = vmatprep.subr.bf16.mxu0 %v3193_v10 }
 0xb73   :  { %768 = vmatpush1.bf16.msra.mxu0 %v3203_v11 }
 0xb74   :  { %769 = vmatprep.subr.bf16.mxu0 %v3209_v12 }
 0xb77   :  { %770 = vmatpush1.bf16.msra.mxu0 %v3218_v13 }
 0xb78   :  { %771 = vmatprep.subr.bf16.mxu0 %v3224_v14 }
 0xb7b   :  { %772 = vmatpush1.bf16.msra.mxu0 %v3232_v15 }
 0xb7c   :  { %2693 = vmatprep.subr.bf16.mxu0 %v3112_v46 }
 0xc2e   :  { %v615_v59 = vpop.f32.mrf.mxu0 }
 0xc2f   :  { %v624_v10 = vrot.slane %v615_v59, 6 }
 0xc30   :  { %v617_v60 = vpop.f32.mrf.mxu0 }
 0xc31   :  { %v625_v61 = vrot.slane %v617_v60, 6  ;;  %v628_v11 = vadd.f32 %v624_v10, %v3253_v26 }
 0xc32   :  { %v619_v62 = vpop.f32.mrf.mxu0 }
 0xc33   :  { %v629_v7 = vadd.f32 %v625_v61, %v3255_v28  ;;  %v2558_v12 = vmul.f32 -1.442695, %v628_v11 }
 0xc34   :  { %v620_v63 = vpop.f32.mrf.mxu0 }
 0xc35   :  { %2946 = vtanh.f32 %v629_v7  ;;  %v2559_v6 = vmul.f32 -1.442695, %v629_v7 }
 0xc36   :  { %2948 = vpow2.f32 %v2558_v12 }
 0xc42   :  { %v2947_v0 = vpop.eup %2946 }
 0xc43   :  { %648 = vrot.lane.b32.xlu1 %v2947_v0, %s3111_s4  ;;  %v2949_v13 = vpop.eup %2948  ;;  %v2566_v0 = vld [vmem:[%s3760_s6] ss:$0 sm:$0xff] }
 0xc44   :  { %v636_v14 = vadd.f32 1.0, %v2949_v13 }
 0xc46   :  { %2950 = vrcp.f32 %v636_v14 }
 0xc53   :  { %v2951_v15 = vpop.eup %2950 }
 0xc54   :  { %v646_v5 = vmul.f32 %v2951_v15, %v644_v4 }
 0xcb5   :  { %v649_v2 = vpop.permute.xlu1 %648 }
 0xcb6   :  { %v651_v3 = vmul.f32 %v2951_v15, %v649_v2 }
 0xcb8   :  { %653 = vrot.lane.b32.xlu0 %v651_v3, %s3111_s4 }
 0xd2a   :  { %v654_v8 = vpop.permute.xlu0 %653 }
 0xd2b   :  { %v656_v9 = vadd.f32 %v654_v8, %v646_v5 }
 0xd2d   :  { %2952 = vtanh.f32 %v656_v9  ;;  %v732_v41 = vrot.slane %v656_v9, 6 }
 0xd2e   :  { %2954 = vpow2.f32 %v2559_v6 }
 0xd3a   :  { %v2953_v16 = vpop.eup %2952 }
 0xd3b   :  { %659 = vrot.lane.b32.xlu1 %v2953_v16, %s3111_s4  ;;  %v2955_v17 = vpop.eup %2954 }
 0xd3c   :  { %v637_v18 = vadd.f32 1.0, %v2955_v17 }
 0xd3e   :  { %2956 = vrcp.f32 %v637_v18 }
 0xd4b   :  { %v2957_v19 = vpop.eup %2956 }
 0xdad   :  { %v660_v30 = vpop.permute.xlu1 %659 }
 0xdae   :  { %v662_v20 = vmul.f32 %v2957_v19, %v660_v30 }
 0xdb0   :  { %v663_v21 = vpack.c.bf16 %v662_v20, %v662_v20 }
 0xdb2   :  { %v665_v22 = vrot.slane %v663_v21, 1 }
 0xdb4   :  { %2560 = vmatmul.mubr.msk.bf16.vlgmr.msra.gmra.mxu1 %vm156_vm2, %v665_v22 }
 0xdb5   :  { %2688 = vmatpush3.bf16.msra.mxu1 %v856_v47  ;;  %2689 = vmatprep.mubr.msk.bf16.mxu1 %vm3113_vm3, %v3112_v46 }
 0xdb6   :  { %2701 = vmatprep.subr.bf16.mxu1 %v3112_v46 }
 0xdbc   :  { %2690 = vmatmul.mubr.msk.bf16.vlgmr.msra.gmra.mxu1 %vm62_vm1, %v847_v50 }
 0xdbd   :  { %2702 = vmatpush3.bf16.msra.mxu1 %v3365_v51  ;;  %2705 = vmatprep.mubr.msk.bf16.mxu1 %vm3113_vm3, %v3112_v46 }
 0xdbe   :  { %2703 = vmatprep.subr.bf16.mxu1 %v3112_v46 }
 0xdc1   :  { %2704 = vmatpush3.bf16.msra.mxu1 %v3375_v52 }
 0xdc2   :  { %2717 = vmatprep.subr.bf16.mxu1 %v3112_v46 }
 0xe74   :  { %v703_v23 = vpop.f32.mrf.mxu1 }
 0xe75   :  { %v712_v32 = vrot.slane %v703_v23, 4 }
 0xe76   :  { %v705_v36 = vpop.f32.mrf.mxu1 }
 0xe77   :  { %v713_v24 = vrot.slane %v705_v36, 4  ;;  %v716_v33 = vadd.f32 %v712_v32, %v3253_v26 }
 0xe78   :  { %v707_v25 = vpop.f32.mrf.mxu1 }
 0xe79   :  { %v717_v27 = vadd.f32 %v713_v24, %v3255_v28  ;;  %v2561_v34 = vmul.f32 -1.442695, %v716_v33 }
 0xe7a   :  { %v708_v29 = vpop.f32.mrf.mxu1 }
 0xe7b   :  { %2958 = vtanh.f32 %v717_v27  ;;  %v2562_v54 = vmul.f32 -1.442695, %v717_v27 }
 0xe7c   :  { %2960 = vpow2.f32 %v2561_v34  ;;  %v892_v62 = vpop.f32.mrf.mxu1 }
 0xe7d   :  { %v3403_v15 = vadd.f32 %v2566_v0, %v892_v62 }
 0xe7e   :  { %v2691_v7 = vpop.f32.mrf.mxu1 }
 0xe80   :  { %v895_v63 = vpop.f32.mrf.mxu1 }
 0xe81   :  { %v3397_v11 = vadd.f32 %v2566_v0, %v895_v63 }
 0xe82   :  { %v2692_v10 = vpop.f32.mrf.mxu1 }
 0xe88   :  { %v2959_v31 = vpop.eup %2958 }
 0xe89   :  { %736 = vrot.lane.b32.xlu0 %v2959_v31, %s3111_s4  ;;  %v2961_v35 = vpop.eup %2960 }
 0xe8a   :  { %v724_v37 = vadd.f32 1.0, %v2961_v35 }
 0xe8c   :  { %2962 = vrcp.f32 %v724_v37 }
 0xe99   :  { %v2963_v38 = vpop.eup %2962 }
 0xe9a   :  { %v734_v42 = vmul.f32 %v2963_v38, %v732_v41 }
 0xefb   :  { %v737_v39 = vpop.permute.xlu0 %736 }
 0xefc   :  { %v739_v40 = vmul.f32 %v2963_v38, %v737_v39 }
 0xefe   :  { %741 = vrot.lane.b32.xlu1 %v739_v40, %s3111_s4 }
 0xf70   :  { %v742_v43 = vpop.permute.xlu1 %741 }
 0xf71   :  { %v3344_v44 = vadd.f32 %v742_v43, %v734_v42 }
 0xf73   :  { %2964 = vtanh.f32 %v3344_v44 }
 0xf74   :  { %2966 = vpow2.f32 %v2562_v54 }
 0xf80   :  { %v2965_v53 = vpop.eup %2964 }
 0xf81   :  { %747 = vrot.lane.b32.xlu0 %v2965_v53, %s3111_s4  ;;  %v2967_v55 = vpop.eup %2966 }
 0xf82   :  { %v725_v56 = vadd.f32 1.0, %v2967_v55 }
 0xf84   :  { %2968 = vrcp.f32 %v725_v56 }
 0xf91   :  { %v2969_v57 = vpop.eup %2968 }
 0xff3   :  { %v748_v58 = vpop.permute.xlu0 %747 }
 0xff4   :  { %v750_v59 = vmul.f32 %v2969_v57, %v748_v58 }
 0xff6   :  { %v751_v60 = vpack.c.bf16 %v750_v59, %v750_v59 }
 0xff8   :  { %v753_v61 = vrot.slane %v751_v60, 2 }
 0xffa   :  { %2563 = vmatmul.mubr.msk.bf16.vlgmr.msra.gmra.mxu0 %vm156_vm2, %v753_v61 }
 0xffb   :  { %2694 = vmatpush3.bf16.msra.mxu0 %v3365_v51  ;;  %2697 = vmatprep.mubr.msk.bf16.mxu0 %vm3113_vm3, %v3112_v46 }
 0xffc   :  { %2695 = vmatprep.subr.bf16.mxu0 %v3112_v46 }
 0xfff   :  { %2696 = vmatpush3.bf16.msra.mxu0 %v3375_v52 }
0x1000   :  { %2709 = vmatprep.subr.bf16.mxu0 %v3112_v46 }
0x1002   :  { %2698 = vmatmul.mubr.bf16.vlgmr.msra.gmra.mxu0 %v3110_v1 }
0x1003   :  { %2710 = vmatpush3.bf16.msra.mxu0 %v3365_v51  ;;  %2713 = vmatprep.mubr.msk.bf16.mxu0 %vm3113_vm3, %v3112_v46 }
0x1004   :  { %2711 = vmatprep.subr.bf16.mxu0 %v3112_v46 }
0x1007   :  { %2712 = vmatpush3.bf16.msra.mxu0 %v3375_v52 }
0x1008   :  { %2725 = vmatprep.subr.bf16.mxu0 %v3112_v46 }
0x10ba   :  { %v3399_v12 = vpop.f32.mrf.mxu0 }
0x10bc   :  { %v3401_v13 = vpop.f32.mrf.mxu0 }
0x10be   :  { %v795_v14 = vpop.f32.mrf.mxu0 }
0x10c0   :  { %v796_v2 = vpop.f32.mrf.mxu0 }
0x10c2   :  { %v948_v3 = vpop.f32.mrf.mxu0 }
0x10c3   :  { %v954_v4 = vadd.f32 %v948_v3, %v3403_v15 }
0x10c4   :  { %v2699_v5 = vpop.f32.mrf.mxu0 }
0x10c5   :  { %2970 = vtanh.f32 %v954_v4  ;;  %v2570_v6 = vmul.f32 -1.442695, %v954_v4 }
0x10c6   :  { %v951_v8 = vpop.f32.mrf.mxu0 }
0x10c7   :  { %2972 = vpow2.f32 %v2570_v6 }
0x10c8   :  { %v2700_v9 = vpop.f32.mrf.mxu0 }
0x10d2   :  { %v2971_v16 = vpop.eup %2970 }
0x10d3   :  { %964 = vrot.lane.b32.xlu1 %v2971_v16, %s3114_s20 }
0x10d4   :  { %v2973_v17 = vpop.eup %2972 }
0x10d5   :  { %v958_v18 = vadd.f32 1.0, %v2973_v17 }
0x10d7   :  { %2974 = vrcp.f32 %v958_v18 }
0x10e4   :  { %v2975_v19 = vpop.eup %2974 }
0x10e5   :  { %v962_v21 = vmul.f32 0.0, %v2975_v19 }
0x1145   :  { %v965_v30 = vpop.permute.xlu1 %964 }
0x1146   :  { %v967_v20 = vmul.f32 %v2975_v19, %v965_v30 }
0x1148   :  { %969 = vrot.lane.b32.xlu0 %v967_v20, %s3114_s20 }
0x11ba   :  { %v970_v22 = vpop.permute.xlu0 %969 }
0x11bb   :  { %v972_v23 = vadd.f32 %v970_v22, %v962_v21 }
0x11bd   :  { %2976 = vtanh.f32 %v972_v23  ;;  %v1044_v47 = vrot.slane %v972_v23, 6 }
0x11ca   :  { %v2977_v36 = vpop.eup %2976 }
0x11cb   :  { %975 = vrot.lane.b32.xlu1 %v2977_v36, %s3114_s20 }
0x123d   :  { %v976_v24 = vpop.permute.xlu1 %975 }
0x123e   :  { %v3409_v25 = vmul.f32 %v2975_v19, %v976_v24 }
0x1240   :  { %v985_v27 = vpack.c.bf16 %v3409_v25, %v3409_v25 }
0x1242   :  { %987 = vrot.lane.b32.xlu0 %v985_v27, %s3111_s4 }
0x12b4   :  { %v988_v29 = vpop.permute.xlu0 %987 }
0x12b5   :  { %2706 = vmatmul.mubr.msk.bf16.vlgmr.msra.gmra.mxu1 %vm911_vm4, %v988_v29 }
0x12b6   :  { %2718 = vmatpush3.bf16.msra.mxu1 %v3365_v51  ;;  %2721 = vmatprep.mubr.msk.bf16.mxu1 %vm3113_vm3, %v3112_v46 }
0x12b7   :  { %2719 = vmatprep.subr.bf16.mxu1 %v3112_v46 }
0x12ba   :  { %2720 = vmatpush3.bf16.msra.mxu1 %v3375_v52 }
0x12bb   :  { %2733 = vmatprep.subr.bf16.mxu1 %v3112_v46 }
0x1375   :  { %v1026_v31 = vpop.f32.mrf.mxu1 }
0x1376   :  { %v1033_v32 = vrot.slane %v1026_v31, 6 }
0x1377   :  { %v2707_v33 = vpop.f32.mrf.mxu1 }
0x1378   :  { %v1035_v34 = vadd.f32 %v1033_v32, %v3403_v15 }
0x1379   :  { %v1029_v35 = vpop.f32.mrf.mxu1 }
0x137a   :  { %2978 = vtanh.f32 %v1035_v34  ;;  %v2572_v39 = vmul.f32 -1.442695, %v1035_v34 }
0x137b   :  { %v2708_v37 = vpop.f32.mrf.mxu1 }
0x137c   :  { %2980 = vpow2.f32 %v2572_v39 }
0x1387   :  { %v2979_v38 = vpop.eup %2978 }
0x1388   :  { %1048 = vrot.lane.b32.xlu1 %v2979_v38, %s3114_s20 }
0x1389   :  { %v2981_v40 = vpop.eup %2980 }
0x138a   :  { %v1039_v41 = vadd.f32 1.0, %v2981_v40 }
0x138c   :  { %2982 = vrcp.f32 %v1039_v41 }
0x1399   :  { %v2983_v42 = vpop.eup %2982 }
0x139a   :  { %v1046_v48 = vmul.f32 %v2983_v42, %v1044_v47 }
0x13fa   :  { %v1049_v43 = vpop.permute.xlu1 %1048 }
0x13fb   :  { %v1051_v45 = vmul.f32 %v2983_v42, %v1049_v43 }
0x13fd   :  { %1053 = vrot.lane.b32.xlu0 %v1051_v45, %s3114_s20 }
0x146f   :  { %v1054_v49 = vpop.permute.xlu0 %1053 }
0x1470   :  { %v1056_v50 = vadd.f32 %v1054_v49, %v1046_v48 }
0x1472   :  { %2984 = vtanh.f32 %v1056_v50  ;;  %v1129_v8 = vrot.slane %v1056_v50, 6 }
0x147f   :  { %v2985_v53 = vpop.eup %2984 }
0x1480   :  { %1059 = vrot.lane.b32.xlu1 %v2985_v53, %s3114_s20 }
0x14f2   :  { %v1060_v54 = vpop.permute.xlu1 %1059 }
0x14f3   :  { %v3425_v55 = vmul.f32 %v2983_v42, %v1060_v54 }
0x14f5   :  { %v1069_v56 = vpack.c.bf16 %v3425_v55, %v3425_v55 }
0x14f7   :  { %v1071_v57 = vrot.slane %v1069_v56, 1 }
0x14f9   :  { %1072 = vrot.lane.b32.xlu0 %v1071_v57, %s3111_s4 }
0x156b   :  { %v1073_v58 = vpop.permute.xlu0 %1072 }
0x156c   :  { %2714 = vmatmul.mubr.msk.bf16.vlgmr.msra.gmra.mxu0 %vm911_vm4, %v1073_v58 }
0x156d   :  { %2726 = vmatpush3.bf16.msra.mxu0 %v3365_v51  ;;  %2729 = vmatprep.mubr.msk.bf16.mxu0 %vm3113_vm3, %v3112_v46 }
0x156e   :  { %2727 = vmatprep.subr.bf16.mxu0 %v3112_v46 }
0x1571   :  { %2728 = vmatpush3.bf16.msra.mxu0 %v3375_v52 }
0x1572   :  { %2741 = vmatprep.subr.bf16.mxu0 %v3112_v46 }
0x162c   :  { %v1111_v59 = vpop.f32.mrf.mxu0 }
0x162d   :  { %v1118_v60 = vrot.slane %v1111_v59, 4 }
0x162e   :  { %v2715_v61 = vpop.f32.mrf.mxu0 }
0x162f   :  { %v1120_v62 = vadd.f32 %v1118_v60, %v3403_v15 }
0x1630   :  { %v1114_v7 = vpop.f32.mrf.mxu0 }
0x1631   :  { %2986 = vtanh.f32 %v1120_v62  ;;  %v2574_v10 = vmul.f32 -1.442695, %v1120_v62 }
0x1632   :  { %v2716_v63 = vpop.f32.mrf.mxu0 }
0x1633   :  { %2988 = vpow2.f32 %v2574_v10 }
0x163e   :  { %v2987_v0 = vpop.eup %2986 }
0x163f   :  { %1133 = vrot.lane.b32.xlu1 %v2987_v0, %s3114_s20 }
0x1640   :  { %v2989_v14 = vpop.eup %2988 }
0x1641   :  { %v1124_v2 = vadd.f32 1.0, %v2989_v14 }
0x1643   :  { %2990 = vrcp.f32 %v1124_v2 }
0x1650   :  { %v2991_v3 = vpop.eup %2990 }
0x1651   :  { %v1131_v9 = vmul.f32 %v2991_v3, %v1129_v8 }
0x16b1   :  { %v1134_v4 = vpop.permute.xlu1 %1133 }
0x16b2   :  { %v1136_v5 = vmul.f32 %v2991_v3, %v1134_v4 }
0x16b4   :  { %1138 = vrot.lane.b32.xlu0 %v1136_v5, %s3114_s20 }
0x1726   :  { %v1139_v16 = vpop.permute.xlu0 %1138 }
0x1727   :  { %v1141_v6 = vadd.f32 %v1139_v16, %v1131_v9 }
0x1729   :  { %2992 = vtanh.f32 %v1141_v6  ;;  %v1214_v39 = vrot.slane %v1141_v6, 6 }
0x1736   :  { %v2993_v17 = vpop.eup %2992 }
0x1737   :  { %1144 = vrot.lane.b32.xlu1 %v2993_v17, %s3114_s20 }
0x17a9   :  { %v1145_v18 = vpop.permute.xlu1 %1144 }
0x17aa   :  { %v3441_v19 = vmul.f32 %v2991_v3, %v1145_v18 }
0x17ac   :  { %v1154_v30 = vpack.c.bf16 %v3441_v19, %v3441_v19 }
0x17ae   :  { %v1156_v20 = vrot.slane %v1154_v30, 2 }
0x17b0   :  { %1157 = vrot.lane.b32.xlu0 %v1156_v20, %s3111_s4 }
0x1822   :  { %v1158_v21 = vpop.permute.xlu0 %1157 }
0x1823   :  { %2722 = vmatmul.mubr.msk.bf16.vlgmr.msra.gmra.mxu1 %vm911_vm4, %v1158_v21 }
0x1824   :  { %2734 = vmatpush3.bf16.msra.mxu1 %v3365_v51  ;;  %2737 = vmatprep.mubr.msk.bf16.mxu1 %vm3113_vm3, %v3112_v46 }
0x1825   :  { %2735 = vmatprep.subr.bf16.mxu1 %v3112_v46 }
0x1828   :  { %2736 = vmatpush3.bf16.msra.mxu1 %v3375_v52 }
0x1829   :  { %2749 = vmatprep.subr.bf16.mxu1 %v3112_v46 }
0x18e3   :  { %v1196_v22 = vpop.f32.mrf.mxu1 }
0x18e4   :  { %v1203_v23 = vrot.slane %v1196_v22, 2 }
0x18e5   :  { %v2723_v36 = vpop.f32.mrf.mxu1 }
0x18e6   :  { %v1205_v24 = vadd.f32 %v1203_v23, %v3403_v15 }
0x18e7   :  { %v1199_v27 = vpop.f32.mrf.mxu1 }
0x18e8   :  { %2994 = vtanh.f32 %v1205_v24  ;;  %v2576_v32 = vmul.f32 -1.442695, %v1205_v24 }
0x18e9   :  { %v2724_v29 = vpop.f32.mrf.mxu1 }
0x18ea   :  { %2996 = vpow2.f32 %v2576_v32 }
0x18f5   :  { %v2995_v31 = vpop.eup %2994 }
0x18f6   :  { %1218 = vrot.lane.b32.xlu1 %v2995_v31, %s3114_s20 }
0x18f7   :  { %v2997_v33 = vpop.eup %2996 }
0x18f8   :  { %v1209_v34 = vadd.f32 1.0, %v2997_v33 }
0x18fa   :  { %2998 = vrcp.f32 %v1209_v34 }
0x1907   :  { %v2999_v35 = vpop.eup %2998 }
0x1908   :  { %v1216_v40 = vmul.f32 %v2999_v35, %v1214_v39 }
0x1968   :  { %v1219_v37 = vpop.permute.xlu1 %1218 }
0x1969   :  { %v1221_v38 = vmul.f32 %v2999_v35, %v1219_v37 }
0x196b   :  { %1223 = vrot.lane.b32.xlu0 %v1221_v38, %s3114_s20 }
0x19dd   :  { %v1224_v41 = vpop.permute.xlu0 %1223 }
0x19de   :  { %v1226_v15 = vadd.f32 %v1224_v41, %v1216_v40 }
0x19e0   :  { %3000 = vtanh.f32 %v1226_v15  ;;  %v1296_v0 = vrot.slane %v1226_v15, 6 }
0x19ed   :  { %v3001_v42 = vpop.eup %3000 }
0x19ee   :  { %1229 = vrot.lane.b32.xlu1 %v3001_v42, %s3114_s20 }
0x1a60   :  { %v1230_v43 = vpop.permute.xlu1 %1229 }
0x1a61   :  { %v3457_v45 = vmul.f32 %v2999_v35, %v1230_v43 }
0x1a63   :  { %v1239_v47 = vpack.c.bf16 %v3457_v45, %v3457_v45 }
0x1a65   :  { %v1241_v48 = vrot.slane %v1239_v47, 3 }
0x1a67   :  { %1242 = vrot.lane.b32.xlu0 %v1241_v48, %s3111_s4 }
0x1ad9   :  { %v1243_v49 = vpop.permute.xlu0 %1242 }
0x1ada   :  { %2730 = vmatmul.mubr.msk.bf16.vlgmr.msra.gmra.mxu0 %vm911_vm4, %v1243_v49 }
0x1adb   :  { %2742 = vmatpush3.bf16.msra.mxu0 %v3365_v51  ;;  %2745 = vmatprep.mubr.msk.bf16.mxu0 %vm3113_vm3, %v3112_v46 }
0x1adc   :  { %2743 = vmatprep.subr.bf16.mxu0 %v3112_v46 }
0x1adf   :  { %2744 = vmatpush3.bf16.msra.mxu0 %v3375_v52 }
0x1ae0   :  { %2757 = vmatprep.subr.bf16.mxu0 %v3112_v46 }
0x1b9a   :  { %v1281_v50 = vpop.f32.mrf.mxu0 }
0x1b9b   :  { %v1287_v53 = vadd.f32 %v1281_v50, %v3397_v11 }
0x1b9c   :  { %v2731_v54 = vpop.f32.mrf.mxu0 }
0x1b9d   :  { %3002 = vtanh.f32 %v1287_v53  ;;  %v2578_v59 = vmul.f32 -1.442695, %v1287_v53 }
0x1b9e   :  { %v1284_v56 = vpop.f32.mrf.mxu0 }
0x1b9f   :  { %3004 = vpow2.f32 %v2578_v59 }
0x1ba0   :  { %v2732_v57 = vpop.f32.mrf.mxu0 }
0x1baa   :  { %v3003_v58 = vpop.eup %3002 }
0x1bab   :  { %1300 = vrot.lane.b32.xlu1 %v3003_v58, %s3114_s20 }
0x1bac   :  { %v3005_v60 = vpop.eup %3004 }
0x1bad   :  { %v1291_v61 = vadd.f32 1.0, %v3005_v60 }
0x1baf   :  { %3006 = vrcp.f32 %v1291_v61 }
0x1bbc   :  { %v3007_v62 = vpop.eup %3006 }
0x1bbd   :  { %v1298_v10 = vmul.f32 %v3007_v62, %v1296_v0 }
0x1c1d   :  { %v1301_v7 = vpop.permute.xlu1 %1300 }
0x1c1e   :  { %v1303_v63 = vmul.f32 %v3007_v62, %v1301_v7 }
0x1c20   :  { %1305 = vrot.lane.b32.xlu0 %v1303_v63, %s3114_s20 }
0x1c92   :  { %v1306_v14 = vpop.permute.xlu0 %1305 }
0x1c93   :  { %v1308_v2 = vadd.f32 %v1306_v14, %v1298_v10 }
0x1c95   :  { %3008 = vtanh.f32 %v1308_v2  ;;  %v1379_v27 = vrot.slane %v1308_v2, 6 }
0x1ca2   :  { %v3009_v3 = vpop.eup %3008 }
0x1ca3   :  { %1311 = vrot.lane.b32.xlu1 %v3009_v3, %s3114_s20 }
0x1d15   :  { %v1312_v4 = vpop.permute.xlu1 %1311 }
0x1d16   :  { %v3473_v5 = vmul.f32 %v3007_v62, %v1312_v4 }
0x1d18   :  { %v1320_v8 = vpack.c.bf16 %v3473_v5, %v3473_v5 }
0x1d1a   :  { %1322 = vrot.lane.b32.xlu0 %v1320_v8, %s3111_s4 }
0x1d8c   :  { %v1323_v9 = vpop.permute.xlu0 %1322 }
0x1d8d   :  { %2738 = vmatmul.mubr.msk.bf16.vlgmr.msra.gmra.mxu1 %vm911_vm4, %v1323_v9 }
0x1d8e   :  { %2750 = vmatpush3.bf16.msra.mxu1 %v3365_v51  ;;  %2753 = vmatprep.mubr.msk.bf16.mxu1 %vm3113_vm3, %v3112_v46 }
0x1d8f   :  { %2751 = vmatprep.subr.bf16.mxu1 %v3112_v46 }
0x1d92   :  { %2752 = vmatpush3.bf16.msra.mxu1 %v3375_v52 }
0x1d93   :  { %2765 = vmatprep.subr.bf16.mxu1 %v3112_v46 }
0x1e4d   :  { %v1361_v16 = vpop.f32.mrf.mxu1 }
0x1e4e   :  { %v1368_v6 = vrot.slane %v1361_v16, 6 }
0x1e4f   :  { %v2739_v17 = vpop.f32.mrf.mxu1 }
0x1e50   :  { %v1370_v18 = vadd.f32 %v1368_v6, %v3397_v11 }
0x1e51   :  { %v1364_v30 = vpop.f32.mrf.mxu1 }
0x1e52   :  { %3010 = vtanh.f32 %v1370_v18  ;;  %v2580_v51 = vmul.f32 -1.442695, %v1370_v18 }
0x1e53   :  { %v2740_v20 = vpop.f32.mrf.mxu1 }
0x1e54   :  { %3012 = vpow2.f32 %v2580_v51 }
0x1e5f   :  { %v3011_v21 = vpop.eup %3010 }
0x1e60   :  { %1383 = vrot.lane.b32.xlu1 %v3011_v21, %s3114_s20 }
0x1e61   :  { %v3013_v22 = vpop.eup %3012 }
0x1e62   :  { %v1374_v23 = vadd.f32 1.0, %v3013_v22 }
0x1e64   :  { %3014 = vrcp.f32 %v1374_v23 }
0x1e71   :  { %v3015_v36 = vpop.eup %3014 }
0x1e72   :  { %v1381_v29 = vmul.f32 %v3015_v36, %v1379_v27 }
0x1ed2   :  { %v1384_v52 = vpop.permute.xlu1 %1383 }
0x1ed3   :  { %v1386_v24 = vmul.f32 %v3015_v36, %v1384_v52 }
0x1ed5   :  { %1388 = vrot.lane.b32.xlu0 %v1386_v24, %s3114_s20 }
0x1f47   :  { %v1389_v31 = vpop.permute.xlu0 %1388 }
0x1f48   :  { %v1391_v32 = vadd.f32 %v1389_v31, %v1381_v29  ;;  %v2883_v29 = vld [vmem:[%s3758_s5 + $0x20] sm:$0xff]   ;;  %v3535_v31 = vld [vmem:[%s3758_s5 + $0x28] sm:$0xff]  }
0x1f4a   :  { %3016 = vtanh.f32 %v1391_v32  ;;  %v1463_v58 = vrot.slane %v1391_v32, 6 }
0x1f57   :  { %v3017_v33 = vpop.eup %3016 }
0x1f58   :  { %1394 = vrot.lane.b32.xlu1 %v3017_v33, %s3114_s20 }
0x1fca   :  { %v1395_v34 = vpop.permute.xlu1 %1394 }
0x1fcb   :  { %v3489_v35 = vmul.f32 %v3015_v36, %v1395_v34 }
0x1fcd   :  { %v1403_v37 = vpack.c.bf16 %v3489_v35, %v3489_v35 }
0x1fcf   :  { %v1405_v38 = vrot.slane %v1403_v37, 1 }
0x1fd1   :  { %1406 = vrot.lane.b32.xlu0 %v1405_v38, %s3111_s4 }
0x2043   :  { %v1407_v39 = vpop.permute.xlu0 %1406 }
0x2044   :  { %2746 = vmatmul.mubr.msk.bf16.vlgmr.msra.gmra.mxu0 %vm911_vm4, %v1407_v39 }
0x2045   :  { %2761 = vmatprep.mubr.msk.bf16.mxu0 %vm3113_vm3, %v3112_v46  ;;  %2758 = vmatpush3.bf16.msra.mxu0 %v2883_v29 }
0x2046   :  { %2759 = vmatprep.subr.bf16.mxu0 %v3112_v46 }
0x2104   :  { %v1445_v40 = vpop.f32.mrf.mxu0 }
0x2105   :  { %v1452_v41 = vrot.slane %v1445_v40, 4 }
0x2106   :  { %v2747_v15 = vpop.f32.mrf.mxu0 }
0x2107   :  { %v1454_v42 = vadd.f32 %v1452_v41, %v3397_v11 }
0x2108   :  { %v1448_v43 = vpop.f32.mrf.mxu0 }
0x2109   :  { %3018 = vtanh.f32 %v1454_v42  ;;  %v2582_v49 = vmul.f32 -1.442695, %v1454_v42  ;;  %v2585_v43 = vld [vmem:[%s3760_s6 + $0x1] ss:$0 sm:$0xff] }
0x210a   :  { %v2748_v47 = vpop.f32.mrf.mxu0 }
0x210b   :  { %3020 = vpow2.f32 %v2582_v49 }
0x2116   :  { %v3019_v48 = vpop.eup %3018 }
0x2117   :  { %1467 = vrot.lane.b32.xlu1 %v3019_v48, %s3114_s20 }
0x2118   :  { %v3021_v50 = vpop.eup %3020 }
0x2119   :  { %v1458_v53 = vadd.f32 1.0, %v3021_v50 }
0x211b   :  { %3022 = vrcp.f32 %v1458_v53 }
0x2128   :  { %v3023_v54 = vpop.eup %3022 }
0x2129   :  { %v1465_v59 = vmul.f32 %v3023_v54, %v1463_v58 }
0x2189   :  { %v1468_v56 = vpop.permute.xlu1 %1467 }
0x218a   :  { %v1470_v57 = vmul.f32 %v3023_v54, %v1468_v56 }
0x218c   :  { %1472 = vrot.lane.b32.xlu0 %v1470_v57, %s3114_s20 }
0x21fe   :  { %v1473_v60 = vpop.permute.xlu0 %1472 }
0x21ff   :  { %v1475_v61 = vadd.f32 %v1473_v60, %v1465_v59 }
0x2201   :  { %3024 = vtanh.f32 %v1475_v61 }
0x220e   :  { %v3025_v62 = vpop.eup %3024 }
0x220f   :  { %1478 = vrot.lane.b32.xlu1 %v3025_v62, %s3114_s20 }
0x2281   :  { %v1479_v7 = vpop.permute.xlu1 %1478 }
0x2282   :  { %v1481_v63 = vmul.f32 %v3023_v54, %v1479_v7 }
0x2284   :  { %v1487_v0 = vpack.c.bf16 %v1481_v63, %v1481_v63 }
0x2286   :  { %v1489_v10 = vrot.slane %v1487_v0, 2 }
0x2288   :  { %1490 = vrot.lane.b32.xlu0 %v1489_v10, %s3111_s4 }
0x22fa   :  { %v1491_v14 = vpop.permute.xlu0 %1490 }
0x22fb   :  { %2754 = vmatmul.mubr.msk.bf16.vlgmr.msra.gmra.mxu1 %vm911_vm4, %v1491_v14 }
0x22fc   :  { %2769 = vmatprep.mubr.msk.bf16.mxu1 %vm3113_vm3, %v3112_v46 }
0x23bb   :  { %v1529_v2 = vpop.f32.mrf.mxu1 }
0x23bc   :  { %v1536_v3 = vrot.slane %v1529_v2, 2 }
0x23bd   :  { %v2755_v4 = vpop.f32.mrf.mxu1 }
0x23be   :  { %v1538_v8 = vadd.f32 %v1536_v3, %v3397_v11  ;;  %v1547_v11 = vrot.slane %v1475_v61, 6 }
0x23bf   :  { %v1532_v9 = vpop.f32.mrf.mxu1 }
0x23c0   :  { %3026 = vtanh.f32 %v1538_v8  ;;  %v2584_v17 = vmul.f32 -1.442695, %v1538_v8 }
0x23c1   :  { %v2756_v16 = vpop.f32.mrf.mxu1 }
0x23c2   :  { %3028 = vpow2.f32 %v2584_v17 }
0x23cd   :  { %v3027_v6 = vpop.eup %3026 }
0x23ce   :  { %1551 = vrot.lane.b32.xlu1 %v3027_v6, %s3114_s20 }
0x23cf   :  { %v3029_v18 = vpop.eup %3028 }
0x23d0   :  { %v1542_v30 = vadd.f32 1.0, %v3029_v18 }
0x23d2   :  { %3030 = vrcp.f32 %v1542_v30 }
0x23df   :  { %v3031_v20 = vpop.eup %3030 }
0x23e0   :  { %v1549_v22 = vmul.f32 %v3031_v20, %v1547_v11 }
0x2440   :  { %v1552_v21 = vpop.permute.xlu1 %1551 }
0x2441   :  { %v1554_v51 = vmul.f32 %v3031_v20, %v1552_v21 }
0x2443   :  { %1556 = vrot.lane.b32.xlu0 %v1554_v51, %s3114_s20 }
0x2447   :  { %980 = vrot.lane.b32.xlu0 %v3409_v25, %s3111_s4 }
0x244b   :  { %1149 = vrot.lane.b32.xlu0 %v3441_v19, %s3111_s4 }
0x244f   :  { %1316 = vrot.lane.b32.xlu0 %v3473_v5, %s3111_s4  ;;  %v3518_v5 = vld [vmem:[%s3758_s5 + $0x30] sm:$0xff]  }
0x2450   :  { %2766 = vmatpush3.bf16.msra.mxu1 %v3518_v5 }
0x2451   :  { %2767 = vmatprep.subr.bf16.mxu1 %v3112_v46 }
0x2453   :  { %1483 = vrot.lane.b32.xlu0 %v1481_v63, %s3111_s4 }
0x2454   :  { %2768 = vmatpush3.bf16.msra.mxu1 %v3535_v31 }
0x2455   :  { %2781 = vmatprep.subr.bf16.mxu1 %v3112_v46 }
0x2457   :  { %2770 = vmatmul.mubr.bf16.vlgmr.msra.gmra.mxu1 %v3110_v1 }
0x2458   :  { %2782 = vmatpush3.bf16.msra.mxu1 %v3518_v5  ;;  %2785 = vmatprep.mubr.msk.bf16.mxu1 %vm3113_vm3, %v3112_v46 }
0x2459   :  { %2783 = vmatprep.subr.bf16.mxu1 %v3112_v46 }
0x245c   :  { %2784 = vmatpush3.bf16.msra.mxu1 %v3535_v31 }
0x245d   :  { %2797 = vmatprep.subr.bf16.mxu1 %v3112_v46 }
0x24b5   :  { %v1557_v23 = vpop.permute.xlu0 %1556 }
0x24b6   :  { %v1559_v36 = vadd.f32 %v1557_v23, %v1549_v22 }
0x24b8   :  { %3032 = vtanh.f32 %v1559_v36 }
0x24b9   :  { %v981_v52 = vpop.permute.xlu0 %980 }
0x24ba   :  { %984 = vst.msk [vmem:[#allocation2] sm:$0x3] %vm983_vm5, %v981_v52 }
0x24bd   :  { %v1150_v24 = vpop.permute.xlu0 %1149 }
0x24be   :  { %1153 = vst.msk [vmem:[#allocation2] sm:$0x30] %vm1152_vm6, %v1150_v24 }
0x24c1   :  { %v1317_v25 = vpop.permute.xlu0 %1316 }
0x24c2   :  { %1319 = vst.msk [vmem:[#allocation2 + $0x8] sm:$0x3] %vm983_vm5, %v1317_v25 }
0x24c5   :  { %v3033_v27 = vpop.eup %3032  ;;  %v1484_v19 = vpop.permute.xlu0 %1483 }
0x24c6   :  { %1486 = vst.msk [vmem:[#allocation2 + $0x8] sm:$0x30] %vm1152_vm6, %v1484_v19  ;;  %1562 = vrot.lane.b32.xlu1 %v3033_v27, %s3114_s20 }
0x24ca   :  { %1064 = vrot.lane.b32.xlu1 %v3425_v55, %s3111_s4  ;;  %v2885_v55 = vld [vmem:[%s3758_s5 + $0x18] sm:$0xff]  }
0x24cb   :  { %2760 = vmatpush3.bf16.msra.mxu0 %v2885_v55 }
0x24cc   :  { %2773 = vmatprep.subr.bf16.mxu0 %v3112_v46 }
0x24ce   :  { %1234 = vrot.lane.b32.xlu1 %v3457_v45, %s3111_s4 }
0x24d2   :  { %1399 = vrot.lane.b32.xlu1 %v3489_v35, %s3111_s4 }
0x2517   :  { %v1689_v40 = vpop.f32.mrf.mxu1 }
0x2519   :  { %v2771_v41 = vpop.f32.mrf.mxu1 }
0x251b   :  { %v1692_v15 = vpop.f32.mrf.mxu1 }
0x251d   :  { %v2772_v42 = vpop.f32.mrf.mxu1 }
0x2538   :  { %v1563_v45 = vpop.permute.xlu1 %1562 }
0x2539   :  { %v1565_v32 = vmul.f32 %v3031_v20, %v1563_v45 }
0x253b   :  { %1567 = vrot.lane.b32.xlu1 %v1565_v32, %s3111_s4 }
0x253c   :  { %v1065_v1 = vpop.permute.xlu1 %1064 }
0x253d   :  { %1068 = vst.msk [vmem:[#allocation2] sm:$0xc] %vm1067_vm7, %v1065_v1 }
0x2540   :  { %v1235_v33 = vpop.permute.xlu1 %1234 }
0x2541   :  { %1238 = vst.msk [vmem:[#allocation2] sm:$0xc0] %vm1237_vm8, %v1235_v33 }
0x2544   :  { %v1400_v34 = vpop.permute.xlu1 %1399 }
0x2545   :  { %1402 = vst.msk [vmem:[#allocation2 + $0x8] sm:$0xc] %vm1067_vm7, %v1400_v34 }
0x2548   :  { %v1571_v37 = vld [vmem:[#allocation2] sm:$0xff] }
0x25ad   :  { %v1568_v35 = vpop.permute.xlu1 %1567 }
0x25ae   :  { %1570 = vst.msk [vmem:[#allocation2 + $0x8] sm:$0xc0] %vm1237_vm8, %v1568_v35 }
0x25b5   :  { %v1572_v38 = vld [vmem:[#allocation2 + $0x8] sm:$0xff] }
0x25b6   :  { %v1582_v39 = vpack.c.bf16 %v1572_v38, %v1571_v37 }
0x25b8   :  { %2762 = vmatmul.mubr.msk.bf16.vlgmr.msra.gmra.mxu0 %vm911_vm4, %v1582_v39 }
0x25b9   :  { %2774 = vmatpush3.bf16.msra.mxu0 %v3518_v5  ;;  %2777 = vmatprep.mubr.msk.bf16.mxu0 %vm3113_vm3, %v3112_v46 }
0x25ba   :  { %2775 = vmatprep.subr.bf16.mxu0 %v3112_v46 }
0x25bd   :  { %2776 = vmatpush3.bf16.msra.mxu0 %v3535_v31 }
0x25be   :  { %2789 = vmatprep.subr.bf16.mxu0 %v3112_v46 }
0x2678   :  { %v1636_v47 = vpop.f32.mrf.mxu0 }
0x2679   :  { %v3562_v48 = vadd.f32 %v2585_v43, %v1636_v47 }
0x267a   :  { %v2763_v49 = vpop.f32.mrf.mxu0 }
0x267b   :  { %v1695_v50 = vadd.f32 %v1689_v40, %v3562_v48 }
0x267c   :  { %v1639_v53 = vpop.f32.mrf.mxu0 }
0x267d   :  { %3034 = vtanh.f32 %v1695_v50  ;;  %v3565_v54 = vadd.f32 %v2585_v43, %v1639_v53  ;;  %v2591_v58 = vmul.f32 -1.442695, %v1695_v50 }
0x267e   :  { %v2764_v56 = vpop.f32.mrf.mxu0 }
0x267f   :  { %3036 = vpow2.f32 %v2591_v58 }
0x268a   :  { %v3035_v57 = vpop.eup %3034 }
0x268b   :  { %1705 = vrot.lane.b32.xlu0 %v3035_v57, %s3114_s20 }
0x268c   :  { %v3037_v59 = vpop.eup %3036 }
0x268d   :  { %v1699_v60 = vadd.f32 1.0, %v3037_v59 }
0x268f   :  { %3038 = vrcp.f32 %v1699_v60 }
0x269c   :  { %v3039_v61 = vpop.eup %3038 }
0x269d   :  { %v1703_v63 = vmul.f32 0.0, %v3039_v61 }
0x26fd   :  { %v1706_v62 = vpop.permute.xlu0 %1705 }
0x26fe   :  { %v1708_v7 = vmul.f32 %v3039_v61, %v1706_v62 }
0x2700   :  { %1710 = vrot.lane.b32.xlu1 %v1708_v7, %s3114_s20 }
0x2772   :  { %v1711_v0 = vpop.permute.xlu1 %1710 }
0x2773   :  { %v1713_v10 = vadd.f32 %v1711_v0, %v1703_v63 }
0x2775   :  { %3040 = vtanh.f32 %v1713_v10  ;;  %v1779_v52 = vrot.slane %v1713_v10, 6 }
0x2782   :  { %v3041_v14 = vpop.eup %3040 }
0x2783   :  { %1716 = vrot.lane.b32.xlu0 %v3041_v14, %s3114_s20 }
0x27f5   :  { %v1717_v2 = vpop.permute.xlu0 %1716 }
0x27f6   :  { %v1719_v3 = vmul.f32 %v3039_v61, %v1717_v2 }
0x27f8   :  { %v1720_v4 = vpack.c.bf16 %v1719_v3, %v1719_v3 }
0x27fa   :  { %1722 = vrot.lane.b32.xlu1 %v1720_v4, %s3111_s4 }
0x286c   :  { %v1723_v8 = vpop.permute.xlu1 %1722 }
0x286d   :  { %2778 = vmatmul.mubr.msk.bf16.vlgmr.msra.gmra.mxu0 %vm911_vm4, %v1723_v8 }
0x286e   :  { %2790 = vmatpush3.bf16.msra.mxu0 %v3518_v5  ;;  %2793 = vmatprep.mubr.msk.bf16.mxu0 %vm3113_vm3, %v3112_v46 }
0x286f   :  { %2791 = vmatprep.subr.bf16.mxu0 %v3112_v46 }
0x2872   :  { %2792 = vmatpush3.bf16.msra.mxu0 %v3535_v31 }
0x2873   :  { %2805 = vmatprep.subr.bf16.mxu0 %v3112_v46 }
0x292d   :  { %v1761_v9 = vpop.f32.mrf.mxu0 }
0x292e   :  { %v1768_v16 = vrot.slane %v1761_v9, 6 }
0x292f   :  { %v2779_v6 = vpop.f32.mrf.mxu0 }
0x2930   :  { %v1770_v17 = vadd.f32 %v1768_v16, %v3562_v48 }
0x2931   :  { %v1764_v18 = vpop.f32.mrf.mxu0 }
0x2932   :  { %3042 = vtanh.f32 %v1770_v17  ;;  %v2593_v21 = vmul.f32 -1.442695, %v1770_v17 }
0x2933   :  { %v2780_v30 = vpop.f32.mrf.mxu0 }
0x2934   :  { %3044 = vpow2.f32 %v2593_v21 }
0x293f   :  { %v3043_v20 = vpop.eup %3042 }
0x2940   :  { %1783 = vrot.lane.b32.xlu0 %v3043_v20, %s3114_s20 }
0x2941   :  { %v3045_v51 = vpop.eup %3044 }
0x2942   :  { %v1774_v11 = vadd.f32 1.0, %v3045_v51 }
0x2944   :  { %3046 = vrcp.f32 %v1774_v11 }
0x2951   :  { %v3047_v22 = vpop.eup %3046 }
0x2952   :  { %v1781_v24 = vmul.f32 %v3047_v22, %v1779_v52 }
0x29b2   :  { %v1784_v23 = vpop.permute.xlu0 %1783 }
0x29b3   :  { %v1786_v36 = vmul.f32 %v3047_v22, %v1784_v23 }
0x29b5   :  { %1788 = vrot.lane.b32.xlu1 %v1786_v36, %s3114_s20 }
0x2a27   :  { %v1789_v25 = vpop.permute.xlu1 %1788 }
0x2a28   :  { %v1791_v27 = vadd.f32 %v1789_v25, %v1781_v24 }
0x2a2a   :  { %3048 = vtanh.f32 %v1791_v27  ;;  %v1858_v50 = vrot.slane %v1791_v27, 6 }
0x2a37   :  { %v3049_v19 = vpop.eup %3048 }
0x2a38   :  { %1794 = vrot.lane.b32.xlu0 %v3049_v19, %s3114_s20 }
0x2aaa   :  { %v1795_v29 = vpop.permute.xlu0 %1794 }
0x2aab   :  { %v1797_v55 = vmul.f32 %v3047_v22, %v1795_v29 }
0x2aad   :  { %v1798_v45 = vpack.c.bf16 %v1797_v55, %v1797_v55 }
0x2aaf   :  { %v1800_v32 = vrot.slane %v1798_v45, 1 }
0x2ab1   :  { %1801 = vrot.lane.b32.xlu1 %v1800_v32, %s3111_s4 }
0x2b23   :  { %v1802_v1 = vpop.permute.xlu1 %1801 }
0x2b24   :  { %2786 = vmatmul.mubr.msk.bf16.vlgmr.msra.gmra.mxu1 %vm911_vm4, %v1802_v1 }
0x2b25   :  { %2798 = vmatpush3.bf16.msra.mxu1 %v3518_v5  ;;  %2801 = vmatprep.mubr.msk.bf16.mxu1 %vm3113_vm3, %v3112_v46 }
0x2b26   :  { %2799 = vmatprep.subr.bf16.mxu1 %v3112_v46 }
0x2b29   :  { %2800 = vmatpush3.bf16.msra.mxu1 %v3535_v31 }
0x2b2a   :  { %2813 = vmatprep.subr.bf16.mxu1 %v3112_v46 }
0x2be4   :  { %v1840_v33 = vpop.f32.mrf.mxu1 }
0x2be5   :  { %v1847_v34 = vrot.slane %v1840_v33, 4 }
0x2be6   :  { %v2787_v35 = vpop.f32.mrf.mxu1 }
0x2be7   :  { %v1849_v37 = vadd.f32 %v1847_v34, %v3562_v48 }
0x2be8   :  { %v1843_v38 = vpop.f32.mrf.mxu1 }
0x2be9   :  { %3050 = vtanh.f32 %v1849_v37  ;;  %v2595_v41 = vmul.f32 -1.442695, %v1849_v37 }
0x2bea   :  { %v2788_v39 = vpop.f32.mrf.mxu1 }
0x2beb   :  { %3052 = vpow2.f32 %v2595_v41 }
0x2bf6   :  { %v3051_v40 = vpop.eup %3050 }
0x2bf7   :  { %1862 = vrot.lane.b32.xlu0 %v3051_v40, %s3114_s20 }
0x2bf8   :  { %v3053_v15 = vpop.eup %3052 }
0x2bf9   :  { %v1853_v42 = vadd.f32 1.0, %v3053_v15 }
0x2bfb   :  { %3054 = vrcp.f32 %v1853_v42 }
0x2c08   :  { %v3055_v43 = vpop.eup %3054 }
0x2c09   :  { %v1860_v53 = vmul.f32 %v3055_v43, %v1858_v50 }
0x2c69   :  { %v1863_v47 = vpop.permute.xlu0 %1862 }
0x2c6a   :  { %v1865_v49 = vmul.f32 %v3055_v43, %v1863_v47 }
0x2c6c   :  { %1867 = vrot.lane.b32.xlu1 %v1865_v49, %s3114_s20 }
0x2cde   :  { %v1868_v56 = vpop.permute.xlu1 %1867 }
0x2cdf   :  { %v1870_v57 = vadd.f32 %v1868_v56, %v1860_v53 }
0x2ce1   :  { %3056 = vtanh.f32 %v1870_v57  ;;  %v1937_v30 = vrot.slane %v1870_v57, 6 }
0x2cee   :  { %v3057_v58 = vpop.eup %3056 }
0x2cef   :  { %1873 = vrot.lane.b32.xlu0 %v3057_v58, %s3114_s20 }
0x2d61   :  { %v1874_v59 = vpop.permute.xlu0 %1873 }
0x2d62   :  { %v1876_v60 = vmul.f32 %v3055_v43, %v1874_v59 }
0x2d64   :  { %v1877_v61 = vpack.c.bf16 %v1876_v60, %v1876_v60 }
0x2d66   :  { %v1879_v62 = vrot.slane %v1877_v61, 2 }
0x2d68   :  { %1880 = vrot.lane.b32.xlu1 %v1879_v62, %s3111_s4 }
0x2dda   :  { %v1881_v7 = vpop.permute.xlu1 %1880 }
0x2ddb   :  { %2794 = vmatmul.mubr.msk.bf16.vlgmr.msra.gmra.mxu0 %vm911_vm4, %v1881_v7 }
0x2ddc   :  { %2806 = vmatpush3.bf16.msra.mxu0 %v3518_v5  ;;  %2809 = vmatprep.mubr.msk.bf16.mxu0 %vm3113_vm3, %v3112_v46 }
0x2ddd   :  { %2807 = vmatprep.subr.bf16.mxu0 %v3112_v46 }
0x2de0   :  { %2808 = vmatpush3.bf16.msra.mxu0 %v3535_v31 }
0x2de1   :  { %2821 = vmatprep.subr.bf16.mxu0 %v3112_v46 }
0x2e9b   :  { %v1919_v63 = vpop.f32.mrf.mxu0 }
0x2e9c   :  { %v1926_v0 = vrot.slane %v1919_v63, 2 }
0x2e9d   :  { %v2795_v10 = vpop.f32.mrf.mxu0 }
0x2e9e   :  { %v1928_v14 = vadd.f32 %v1926_v0, %v3562_v48 }
0x2e9f   :  { %v1922_v2 = vpop.f32.mrf.mxu0 }
0x2ea0   :  { %3058 = vtanh.f32 %v1928_v14  ;;  %v2597_v8 = vmul.f32 -1.442695, %v1928_v14 }
0x2ea1   :  { %v2796_v3 = vpop.f32.mrf.mxu0 }
0x2ea2   :  { %3060 = vpow2.f32 %v2597_v8 }
0x2ead   :  { %v3059_v4 = vpop.eup %3058 }
0x2eae   :  { %1941 = vrot.lane.b32.xlu0 %v3059_v4, %s3114_s20 }
0x2eaf   :  { %v3061_v9 = vpop.eup %3060 }
0x2eb0   :  { %v1932_v16 = vadd.f32 1.0, %v3061_v9 }
0x2eb2   :  { %3062 = vrcp.f32 %v1932_v16 }
0x2ebf   :  { %v3063_v6 = vpop.eup %3062 }
0x2ec0   :  { %v1939_v20 = vmul.f32 %v3063_v6, %v1937_v30 }
0x2f20   :  { %v1942_v17 = vpop.permute.xlu0 %1941 }
0x2f21   :  { %v1944_v18 = vmul.f32 %v3063_v6, %v1942_v17 }
0x2f23   :  { %1946 = vrot.lane.b32.xlu1 %v1944_v18, %s3114_s20 }
0x2f95   :  { %v1947_v21 = vpop.permute.xlu1 %1946 }
0x2f96   :  { %v1949_v48 = vadd.f32 %v1947_v21, %v1939_v20 }
0x2f98   :  { %3064 = vtanh.f32 %v1949_v48  ;;  %v2013_v37 = vrot.slane %v1949_v48, 6 }
0x2fa5   :  { %v3065_v51 = vpop.eup %3064 }
0x2fa6   :  { %1952 = vrot.lane.b32.xlu0 %v3065_v51, %s3114_s20 }
0x3018   :  { %v1953_v11 = vpop.permute.xlu0 %1952 }
0x3019   :  { %v1955_v22 = vmul.f32 %v3063_v6, %v1953_v11 }
0x301b   :  { %v1956_v23 = vpack.c.bf16 %v1955_v22, %v1955_v22 }
0x301d   :  { %v1958_v36 = vrot.slane %v1956_v23, 3 }
0x301f   :  { %1959 = vrot.lane.b32.xlu1 %v1958_v36, %s3111_s4 }
0x3091   :  { %v1960_v52 = vpop.permute.xlu1 %1959 }
0x3092   :  { %2802 = vmatmul.mubr.msk.bf16.vlgmr.msra.gmra.mxu1 %vm911_vm4, %v1960_v52 }
0x3093   :  { %2814 = vmatpush3.bf16.msra.mxu1 %v3518_v5  ;;  %2817 = vmatprep.mubr.msk.bf16.mxu1 %vm3113_vm3, %v3112_v46 }
0x3094   :  { %2815 = vmatprep.subr.bf16.mxu1 %v3112_v46 }
0x3097   :  { %2816 = vmatpush3.bf16.msra.mxu1 %v3535_v31 }
0x3098   :  { %2829 = vmatprep.subr.mxu1 %v3112_v46 }
0x3152   :  { %v1998_v24 = vpop.f32.mrf.mxu1 }
0x3153   :  { %v2004_v25 = vadd.f32 %v1998_v24, %v3565_v54 }
0x3154   :  { %v2803_v27 = vpop.f32.mrf.mxu1 }
0x3155   :  { %3066 = vtanh.f32 %v2004_v25  ;;  %v2599_v45 = vmul.f32 -1.442695, %v2004_v25 }
0x3156   :  { %v2001_v19 = vpop.f32.mrf.mxu1 }
0x3157   :  { %3068 = vpow2.f32 %v2599_v45 }
0x3158   :  { %v2804_v29 = vpop.f32.mrf.mxu1 }
0x3162   :  { %v3067_v55 = vpop.eup %3066 }
0x3163   :  { %2017 = vrot.lane.b32.xlu0 %v3067_v55, %s3114_s20  ;;  %v801_v55 = vrot.slane %v3401_v13, 2 }
0x3164   :  { %v3069_v32 = vpop.eup %3068 }
0x3165   :  { %v2008_v1 = vadd.f32 1.0, %v3069_v32  ;;  %v3643_v45 = vadd.f32 %v801_v55, %v3255_v28  ;;  %v2327_v55 = vld [vmem:[%s3762_s8 + $0x58] sm:$0xff] }
0x3167   :  { %3070 = vrcp.f32 %v2008_v1 }
0x3174   :  { %v3071_v33 = vpop.eup %3070 }
0x3175   :  { %v2015_v38 = vmul.f32 %v3071_v33, %v2013_v37  ;;  %v800_v37 = vrot.slane %v3399_v12, 2  ;;  %v2323_v12 = vld [vmem:[%s3762_s8 + $0x38] sm:$0xff] }
0x31d5   :  { %v2018_v34 = vpop.permute.xlu0 %2017 }
0x31d6   :  { %v2020_v35 = vmul.f32 %v3071_v33, %v2018_v34 }
0x31d8   :  { %2022 = vrot.lane.b32.xlu1 %v2020_v35, %s3114_s20 }
0x324a   :  { %v2023_v39 = vpop.permute.xlu1 %2022 }
0x324b   :  { %v2025_v40 = vadd.f32 %v2023_v39, %v2015_v38  ;;  %v804_v38 = vadd.f32 %v800_v37, %v3253_v26  ;;  %v2608_v26 = vld [vmem:[%s3761_s7 + $0x2] ss:$0 sm:$0xff]  ;;  %v2611_v37 = vld [vmem:[%s3761_s7 + $0x5] ss:$0 sm:$0xff] }
0x324d   :  { %3072 = vtanh.f32 %v2025_v40  ;;  %v2091_v63 = vrot.slane %v2025_v40, 6  ;;  %v2564_v39 = vmul.f32 -1.442695, %v804_v38 }
0x325a   :  { %v3073_v41 = vpop.eup %3072 }
0x325b   :  { %2028 = vrot.lane.b32.xlu0 %v3073_v41, %s3114_s20 }
0x32cd   :  { %v2029_v15 = vpop.permute.xlu0 %2028 }
0x32ce   :  { %v2031_v42 = vmul.f32 %v3071_v33, %v2029_v15 }
0x32d0   :  { %v2032_v43 = vpack.c.bf16 %v2031_v42, %v2031_v42 }
0x32d2   :  { %2034 = vrot.lane.b32.xlu1 %v2032_v43, %s3111_s4  ;;  %v2322_v43 = vld [vmem:[%s3762_s8 + $0x30] sm:$0xff] }
0x3344   :  { %v2035_v47 = vpop.permute.xlu1 %2034 }
0x3345   :  { %2810 = vmatmul.mubr.msk.bf16.vlgmr.msra.gmra.mxu0 %vm911_vm4, %v2035_v47  ;;  %v2321_v47 = vld [vmem:[%s3762_s8 + $0x28] sm:$0xff] }
0x3346   :  { %2822 = vmatpush3.bf16.msra.mxu0 %v3518_v5  ;;  %2825 = vmatprep.mubr.msk.bf16.mxu0 %vm3113_vm3, %v3112_v46 }
0x3347   :  { %2823 = vmatprep.subr.bf16.mxu0 %v3112_v46 }
0x334a   :  { %2824 = vmatpush3.bf16.msra.mxu0 %v3535_v31 }
0x334b   :  { %2840 = vmatprep.subr.mxu0 %v3112_v46 }
0x3405   :  { %v2073_v49 = vpop.f32.mrf.mxu0 }
0x3406   :  { %v2080_v50 = vrot.slane %v2073_v49, 6  ;;  %v820_v49 = vrot.slane %v3344_v44, 6  ;;  %v2318_v44 = vld [vmem:[%s3762_s8 + $0x10] sm:$0xff] }
0x3407   :  { %v2811_v53 = vpop.f32.mrf.mxu0 }
0x3408   :  { %v2082_v56 = vadd.f32 %v2080_v50, %v3565_v54 }
0x3409   :  { %v2076_v57 = vpop.f32.mrf.mxu0 }
0x340a   :  { %3074 = vtanh.f32 %v2082_v56  ;;  %v2601_v5 = vmul.f32 -1.442695, %v2082_v56  ;;  %v2320_v57 = vld [vmem:[%s3762_s8 + $0x20] sm:$0xff] }
0x340b   :  { %v2812_v58 = vpop.f32.mrf.mxu0 }
0x340c   :  { %3076 = vpow2.f32 %v2601_v5  ;;  %v2319_v58 = vld [vmem:[%s3762_s8 + $0x18] sm:$0xff]  ;;  %v2316_v5 = vld [vmem:[%s3762_s8] sm:$0xff] }
0x3417   :  { %v3075_v59 = vpop.eup %3074 }
0x3418   :  { %2095 = vrot.lane.b32.xlu0 %v3075_v59, %s3114_s20  ;;  %v2317_v59 = vld [vmem:[%s3762_s8 + $0x8] sm:$0xff] }
0x3419   :  { %v3077_v60 = vpop.eup %3076 }
0x341a   :  { %v2086_v61 = vadd.f32 1.0, %v3077_v60 }
0x341c   :  { %3078 = vrcp.f32 %v2086_v61 }
0x3429   :  { %v3079_v62 = vpop.eup %3078 }
0x342a   :  { %v2093_v0 = vmul.f32 %v3079_v62, %v2091_v63 }
0x348a   :  { %v2096_v31 = vpop.permute.xlu0 %2095 }
0x348b   :  { %v2098_v7 = vmul.f32 %v3079_v62, %v2096_v31 }
0x348d   :  { %2100 = vrot.lane.b32.xlu1 %v2098_v7, %s3114_s20 }
0x34ff   :  { %v2101_v10 = vpop.permute.xlu1 %2100 }
0x3500   :  { %v2103_v14 = vadd.f32 %v2101_v10, %v2093_v0 }
0x3502   :  { %3080 = vtanh.f32 %v2103_v14  ;;  %v2170_v24 = vrot.slane %v2103_v14, 6  ;;  %v2565_v14 = vmul.f32 -1.442695, %v3643_v45 }
0x350f   :  { %v3081_v2 = vpop.eup %3080 }
0x3510   :  { %2106 = vrot.lane.b32.xlu0 %v3081_v2, %s3114_s20 }
0x3582   :  { %v2107_v3 = vpop.permute.xlu0 %2106 }
0x3583   :  { %v2109_v4 = vmul.f32 %v3079_v62, %v2107_v3 }
0x3585   :  { %v2110_v8 = vpack.c.bf16 %v2109_v4, %v2109_v4 }
0x3587   :  { %v2112_v9 = vrot.slane %v2110_v8, 1 }
0x3589   :  { %2113 = vrot.lane.b32.xlu1 %v2112_v9, %s3111_s4  ;;  %v2606_v9 = vld [vmem:[%s3761_s7] ss:$0 sm:$0xff] }
0x35fb   :  { %v2114_v16 = vpop.permute.xlu1 %2113 }
0x35fc   :  { %2818 = vmatmul.mubr.msk.bf16.vlgmr.msra.gmra.mxu1 %vm911_vm4, %v2114_v16 }
0x35fd   :  { %2837 = vmatprep.mubr.msk.f32.mxu1 %vm3113_vm3, %v3112_v46  ;;  %2830 = vmatpush3.msra.mxu1 %v2327_v55 }
0x35fe   :  { %2831 = vmatprep.subr.mxu1 %v3112_v46 }
0x36bc   :  { %v2152_v6 = vpop.f32.mrf.mxu1 }
0x36bd   :  { %v2159_v17 = vrot.slane %v2152_v6, 4  ;;  %v2607_v6 = vld [vmem:[%s3761_s7 + $0x1] ss:$0 sm:$0xff] }
0x36be   :  { %v2819_v18 = vpop.f32.mrf.mxu1 }
0x36bf   :  { %v2161_v30 = vadd.f32 %v2159_v17, %v3565_v54 }
0x36c0   :  { %v2155_v20 = vpop.f32.mrf.mxu1 }
0x36c1   :  { %3082 = vtanh.f32 %v2161_v30  ;;  %v2603_v51 = vmul.f32 -1.442695, %v2161_v30 }
0x36c2   :  { %v2820_v21 = vpop.f32.mrf.mxu1 }
0x36c3   :  { %3084 = vpow2.f32 %v2603_v51 }
0x36ce   :  { %v3083_v48 = vpop.eup %3082 }
0x36cf   :  { %2174 = vrot.lane.b32.xlu0 %v3083_v48, %s3114_s20 }
0x36d0   :  { %v3085_v11 = vpop.eup %3084 }
0x36d1   :  { %v2165_v22 = vadd.f32 1.0, %v3085_v11 }
0x36d3   :  { %3086 = vrcp.f32 %v2165_v22 }
0x36e0   :  { %v3087_v23 = vpop.eup %3086 }
0x36e1   :  { %v2172_v25 = vmul.f32 %v3087_v23, %v2170_v24 }
0x3741   :  { %v2175_v36 = vpop.permute.xlu0 %2174 }
0x3742   :  { %v2177_v52 = vmul.f32 %v3087_v23, %v2175_v36 }
0x3744   :  { %2179 = vrot.lane.b32.xlu1 %v2177_v52, %s3114_s20 }
0x37b6   :  { %v2180_v27 = vpop.permute.xlu1 %2179 }
0x37b7   :  { %v3637_v19 = vadd.f32 %v2180_v27, %v2172_v25 }
0x37b9   :  { %3088 = vtanh.f32 %v3637_v19  ;;  %v2249_v36 = vrot.slane %v3637_v19, 6  ;;  %v2325_v19 = vld [vmem:[%s3762_s8 + $0x48] sm:$0xff] }
0x37ba   :  { %3090 = vtanh.f32 %v3643_v45  ;;  %v2326_v45 = vld [vmem:[%s3762_s8 + $0x50] sm:$0xff] }
0x37bb   :  { %3092 = vpow2.f32 %v2564_v39  ;;  %2832 = vmatpush3.msra.mxu1 %v2326_v45 }
0x37bc   :  { %2833 = vmatprep.subr.mxu1 %v3112_v46 }
0x37bd   :  { %2834 = vmatpush3.msra.mxu1 %v2325_v19 }
0x37be   :  { %2835 = vmatprep.subr.mxu1 %v3112_v46 }
0x37c6   :  { %v3089_v29 = vpop.eup %3088 }
0x37c7   :  { %2185 = vrot.lane.b32.xlu0 %v3089_v29, %s3114_s20  ;;  %v3091_v35 = vpop.eup %3090 }
0x37c8   :  { %v3093_v13 = vpop.eup %3092 }
0x37c9   :  { %v812_v28 = vadd.f32 1.0, %v3093_v13 }
0x37cb   :  { %3094 = vrcp.f32 %v812_v28 }
0x37d8   :  { %v3095_v41 = vpop.eup %3094 }
0x37d9   :  { %v822_v50 = vmul.f32 %v3095_v41, %v820_v49 }
0x3839   :  { %v2186_v32 = vpop.permute.xlu0 %2185 }
0x383a   :  { %v2188_v1 = vmul.f32 %v3087_v23, %v2186_v32 }
0x383c   :  { %v2189_v33 = vpack.c.bf16 %v2188_v1, %v2188_v1  ;;  %v2609_v1 = vld [vmem:[%s3761_s7 + $0x3] ss:$0 sm:$0xff] }
0x383e   :  { %v2191_v34 = vrot.slane %v2189_v33, 2  ;;  %v2324_v33 = vld [vmem:[%s3762_s8 + $0x40] sm:$0xff] }
0x383f   :  { %2836 = vmatpush3.msra.mxu1 %v2324_v33 }
0x3840   :  { %2192 = vrot.lane.b32.xlu1 %v2191_v34, %s3111_s4  ;;  %v2610_v34 = vld [vmem:[%s3761_s7 + $0x4] ss:$0 sm:$0xff] }
0x3844   :  { %824 = vrot.lane.b32.xlu1 %v3091_v35, %s3111_s4  ;;  %v2268_v35 = vld [vmem:[%s3763_s2] sm:$0x3] }
0x3845   :  { %v2308_v39 = vmul.f32 %v2610_v34, %v2268_v35 }
0x3847   :  { %v2314_v28 = vadd.f32 %v2611_v37, %v2308_v39 }
0x38b2   :  { %v2193_v40 = vpop.permute.xlu1 %2192 }
0x38b3   :  { %2826 = vmatmul.mubr.msk.bf16.vlgmr.msra.gmra.mxu0 %vm911_vm4, %v2193_v40 }
0x38b4   :  { %2856 = vmatprep.mubr.msk.f32.mxu0 %vm3113_vm3, %v3112_v46  ;;  %2841 = vmatpush3.msra.mxu0 %v2323_v12 }
0x38b5   :  { %2842 = vmatprep.subr.mxu0 %v3112_v46 }
0x38b6   :  { %v825_v15 = vpop.permute.xlu1 %824  ;;  %2843 = vmatpush3.msra.mxu0 %v2322_v43  ;;  %v2614_v43 = vld [vmem:[%s3762_s8 + $0x60] ss:$0 sm:$0xff] }
0x38b7   :  { %v827_v42 = vmul.f32 %v3095_v41, %v825_v15  ;;  %2844 = vmatprep.subr.mxu0 %v3112_v46  ;;  %v2315_v41 = vmax.f32 %v2314_v28, 0.0 }
0x38b8   :  { %2845 = vmatpush3.msra.mxu0 %v2321_v47 }
0x38b9   :  { %829 = vrot.lane.b32.xlu1 %v827_v42, %s3111_s4  ;;  %2846 = vmatprep.subr.mxu0 %v3112_v46 }
0x38ba   :  { %2847 = vmatpush3.msra.mxu0 %v2320_v57 }
0x38bb   :  { %2848 = vmatprep.subr.mxu0 %v3112_v46 }
0x38bc   :  { %2849 = vmatpush3.msra.mxu0 %v2319_v58 }
0x38bd   :  { %2288 = vrot.lane.b32.xlu1 %v2608_v26, %s3111_s4  ;;  %2850 = vmatprep.subr.mxu0 %v3112_v46 }
0x38be   :  { %2851 = vmatpush3.msra.mxu0 %v2318_v44  ;;  %v2616_v44 = vld [vmem:[%s3762_s8 + $0x62] ss:$0 sm:$0xff] }
0x38bf   :  { %2852 = vmatprep.subr.mxu0 %v3112_v46 }
0x38c0   :  { %2853 = vmatpush3.msra.mxu0 %v2317_v59 }
0x38c1   :  { %2854 = vmatprep.subr.mxu0 %v3112_v46 }
0x38c2   :  { %2855 = vmatpush3.msra.mxu0 %v2316_v5  ;;  %v2617_v5 = vld [vmem:[%s3762_s8 + $0x63] ss:$0 sm:$0xff] }
0x392b   :  { %v830_v53 = vpop.permute.xlu1 %829 }
0x392c   :  { %v832_v56 = vadd.f32 %v830_v53, %v822_v50 }
0x392e   :  { %3096 = vtanh.f32 %v832_v56  ;;  %v2615_v56 = vld [vmem:[%s3762_s8 + $0x61] ss:$0 sm:$0xff] }
0x392f   :  { %v2289_v4 = vpop.permute.xlu1 %2288 }
0x393b   :  { %v3097_v60 = vpop.eup %3096 }
0x393c   :  { %835 = vrot.lane.b32.xlu1 %v3097_v60, %s3111_s4 }
0x3940   :  { %2481 = vperm.xlu1 %2864, %v2315_v41  }
0x3973   :  { %v2231_v61 = vpop.f32.mrf.mxu0 }
0x3974   :  { %v2238_v62 = vrot.slane %v2231_v61, 2 }
0x3975   :  { %v2827_v31 = vpop.f32.mrf.mxu0 }
0x3976   :  { %v2240_v7 = vadd.f32 %v2238_v62, %v3565_v54  ;;  %v2618_v62 = vld [vmem:[%s3762_s8 + $0x64] ss:$0 sm:$0xff] }
0x3977   :  { %v2234_v63 = vpop.f32.mrf.mxu0 }
0x3978   :  { %3098 = vtanh.f32 %v2240_v7  ;;  %v2605_v21 = vmul.f32 -1.442695, %v2240_v7 }
0x3979   :  { %v2828_v0 = vpop.f32.mrf.mxu0  ;;  %3100 = vpow2.f32 %v2565_v14 }
0x397a   :  { %v2619_v0 = vld [vmem:[%s3762_s8 + $0x65] ss:$0 sm:$0xff] }
0x3985   :  { %v3099_v10 = vpop.eup %3098 }
0x3986   :  { %2253 = vrot.lane.b32.xlu0 %v3099_v10, %s3114_s20  ;;  %v3101_v2 = vpop.eup %3100 }
0x3987   :  { %v813_v3 = vadd.f32 1.0, %v3101_v2 }
0x3989   :  { %3102 = vrcp.f32 %v813_v3 }
0x398a   :  { %3104 = vpow2.f32 %v2605_v21 }
0x3996   :  { %v3103_v8 = vpop.eup %3102 }
0x3997   :  { %v3105_v48 = vpop.eup %3104 }
0x3998   :  { %v2244_v51 = vadd.f32 1.0, %v3105_v48 }
0x399a   :  { %3106 = vrcp.f32 %v2244_v51 }
0x39a7   :  { %v3107_v11 = vpop.eup %3106 }
0x39a8   :  { %v2251_v52 = vmul.f32 %v3107_v11, %v2249_v36 }
0x39ae   :  { %v836_v16 = vpop.permute.xlu1 %835 }
0x39af   :  { %v838_v54 = vmul.f32 %v3103_v8, %v836_v16 }
0x39b1   :  { %v2274_v17 = vmul.f32 %v2606_v9, %v838_v54 }
0x39b3   :  { %v2280_v18 = vadd.f32 %v2607_v6, %v2274_v17 }
0x39b5   :  { %v2281_v30 = vmax.f32 %v2280_v18, 0.0 }
0x39b7   :  { %v2405_v20 = vrot.slane %v2281_v30, 6 }
0x39b9   :  { %2857 = vmatmul.mubr.msk.f32.vlgmr.msra.gmra.mxu0 %vm156_vm2, %v2405_v20 }
0x39bb   :  { %v2482_v47 = vpop.permute.xlu1 %2481 }
0x39bc   :  { %v2488_v49 = vmul.f32 %v2614_v43, %v2482_v47 }
0x39f8   :  { %v2254_v22 = vpop.permute.xlu0 %2253 }
0x39f9   :  { %v2256_v23 = vmul.f32 %v3107_v11, %v2254_v22 }
0x39fb   :  { %2258 = vrot.lane.b32.xlu0 %v2256_v23, %s3114_s20 }
0x3a6d   :  { %v2259_v24 = vpop.permute.xlu0 %2258 }
0x3a6e   :  { %v2261_v25 = vadd.f32 %v2259_v24, %v2251_v52 }
0x3a70   :  { %3108 = vtanh.f32 %v2261_v25 }
0x3a79   :  { %v2474_v27 = vpop.f32.mrf.mxu0 }
0x3a7b   :  { %v2858_v29 = vpop.f32.mrf.mxu0 }
0x3a7d   :  { %v3109_v32 = vpop.eup %3108 }
0x3a7e   :  { %2264 = vrot.lane.b32.xlu0 %v3109_v32, %s3114_s20 }
0x3a82   :  { %2298 = vrot.lane.b32.xlu0 %v2609_v1, %s3111_s4 }
0x3af0   :  { %v2265_v38 = vpop.permute.xlu0 %2264 }
0x3af1   :  { %v2267_v13 = vmul.f32 %v3107_v11, %v2265_v38 }
0x3af3   :  { %v2291_v46 = vmul.f32 %v2289_v4, %v2267_v13 }
0x3af4   :  { %v2299_v40 = vpop.permute.xlu0 %2298 }
0x3af5   :  { %v2301_v15 = vadd.f32 %v2299_v40, %v2291_v46 }
0x3af7   :  { %v2302_v42 = vmax.f32 %v2301_v15, 0.0 }
0x3af9   :  { %v2329_v26 = vrot.slane %v2302_v42, 6 }
0x3afb   :  { %2330 = vrot.lane.b32.xlu0 %v2329_v26, %s3111_s4 }
0x3b6d   :  { %v2331_v12 = vpop.permute.xlu0 %2330 }
0x3b6e   :  { %2838 = vmatmul.mubr.msk.f32.vlgmr.msra.gmra.mxu1 %vm911_vm4, %v2331_v12 }
0x3c2e   :  { %v2400_v50 = vpop.f32.mrf.mxu1 }
0x3c2f   :  { %v2475_v53 = vadd.f32 %v2474_v27, %v2400_v50 }
0x3c30   :  { %v2839_v57 = vpop.f32.mrf.mxu1 }
0x3c31   :  { %v2489_v58 = vadd.f32 %v2488_v49, %v2475_v53 }
0x3c33   :  { %v2495_v59 = vadd.f32 %v2615_v56, %v2489_v58 }
0x3c35   :  { %v2501_v60 = vmul.f32 %v2616_v44, %v2495_v59 }
0x3c37   :  { %v2507_v61 = vadd.f32 %v2617_v5, %v2501_v60 }
0x3c39   :  { %v2508_v31 = vmax.f32 %v2507_v61, 0.0 }
0x3c3b   :  { %v2514_v7 = vmul.f32 %v2618_v62, %v2508_v31 }
0x3c3d   :  { %v2516_v63 = vsel %vm2515_vm9, %v2514_v7, 0.0 }
0x3c3e   :  { %2517 = vadd.xlane.f32.xlu0 %v2516_v63 }
0x3cc7   :  { %v2518_v10 = vpop.xlane.xlu0 %2517 }
0x3cc8   :  { %v2524_v14 = vadd.f32 %v2619_v0, %v2518_v10 }
0x3cca   :  { %2526 = vst.msk [vmem:[%s3764_s9] sm:$0x3] %vm2525_vm10, %v2524_v14 }

</bundles_post_ra>
